<compile_context>
chip_gen: v6e
topology: v6e:2x2x1
jax: 0.10.0
libtpu: 0.0.40
codegen_flags: <defaults>
</compile_context>

<pallas_src>
import functools

import jax
import jax.numpy as jnp
from jax import lax
from jax.experimental import pallas as pl
from jax.experimental.pallas import tpu as pltpu


# ---------------------------------------------------------------------------
# In-kernel helpers
# ---------------------------------------------------------------------------
def _activate(y, act):
    if act in ('silu', 'swish'):
        return y * jax.nn.sigmoid(y)
    if act == 'relu':
        return jnp.maximum(y, 0.0)
    if act == 'lrelu':
        return jnp.where(y > 0, y, 0.1 * y)      # LeakyReLU(0.1) per get_activation
    if act == 'hardsigmoid':
        return jnp.clip(y / 6.0 + 0.5, 0.0, 1.0)
    if act is None:
        return y
    raise AttributeError('Unsupported act type: {}'.format(act))


def _conv3x3_rows(xin, w_ref, b_ref, *, W, C):
    """3x3 conv, stride 1.  W zero-padding is built here; the caller supplies
    one halo row on each side of `xin` (H padding is the caller's problem).

    xin:   (R, W, C)   bf16 value  (R = rows_out + 2)
    w_ref: (3, 3C, C)  bf16 ref    (column taps packed along K: [w-1 | w | w+1])
    b_ref: (1, C)      f32 ref
    returns (R - 2, W, C) f32
    """
    R = xin.shape[0]
    rout = R - 2

    # Column-shifted copies (zero column = conv W padding) packed along the
    # contraction axis, so each MXU matmul has K = 3*C (3x fewer, 3x fatter
    # matmuls than one-dot-per-tap) and no tap read is sublane-misaligned.
    # TODO(synk): pltpu.roll along the sublane axis + edge mask would put the
    #             shifts on the XLU slot (overlaps with MXU work).
    zcol = jnp.zeros((R, 1, C), xin.dtype)
    x_l = jnp.concatenate([zcol, xin[:, :W - 1, :]], axis=1)   # x[h, w-1]
    x_r = jnp.concatenate([xin[:, 1:, :], zcol], axis=1)       # x[h, w+1]
    pk = jnp.concatenate([x_l, xin, x_r], axis=-1)             # (R, W, 3C)

    # Bias-initialised accumulator; 3 row-tap matmuls chained on top with
    # f32 MXU accumulation.  Row slices of `pk` are H-only offsets.
    acc = jnp.broadcast_to(b_ref[...], (rout * W, C))
    for kh in range(3):
        patch = pk[kh:kh + rout].reshape(rout * W, 3 * C)
        acc = acc + jnp.dot(patch, w_ref[kh],
                            preferred_element_type=jnp.float32)
    return acc.reshape(rout, W, C)


# ---------------------------------------------------------------------------
# Kernel: one grid step = (batch b, row tile t) -> TH output rows.
# ---------------------------------------------------------------------------
def _basic_block_kernel(x_ref, wa_ref, ba_ref, wb_ref, bb_ref, o_ref,
                        *, H, W, C, TH, act, shortcut):
    """
    x_ref:  (H, W, C)   bf16  full NHWC image of batch b (re-DMA'd per b only)
    wa_ref: (3, 3C, C)  bf16  merged RepVGG (3x3 + centred 1x1, BN folded)
    ba_ref: (1, C)      f32
    wb_ref: (3, 3C, C)  bf16  conv1 (BN folded)
    bb_ref: (1, C)      f32
    o_ref:  (TH, W, C)  bf16  output rows [t*TH, (t+1)*TH)
    """
    t = pl.program_id(1)
    nt = pl.num_programs(1)
    r0 = pl.multiple_of(t * TH, TH)

    # --- gather TH+4 input rows [r0-2, r0+TH+2); out-of-image rows are zero
    #     (they are stage A's zero padding).  The 2 halo rows on each side are
    #     either both inside or both outside the image because TH >= 2.
    x_mid = x_ref[pl.ds(r0, TH)]                                 # rows r0..r0+TH-1
    x_top = x_ref[pl.ds(jnp.maximum(r0 - 2, 0), 2)]
    x_bot = x_ref[pl.ds(jnp.minimum(r0 + TH, H - 2), 2)]
    zeros2 = jnp.zeros_like(x_top)
    x_top = jnp.where(t > 0, x_top, zeros2)
    x_bot = jnp.where(t < nt - 1, x_bot, zeros2)
    xt = jnp.concatenate([x_top, x_mid, x_bot], axis=0)          # (TH+4, W, C)

    # --- stage A: merged RepVGG 3x3 conv + act on rows [r0-1, r0+TH+1).
    y1 = _activate(_conv3x3_rows(xt, wa_ref, ba_ref, W=W, C=C), act)
    # Rows outside the image must be zero: they are conv1's zero padding,
    # not "activation of padded input".
    rows = (r0 - 1) + lax.broadcasted_iota(jnp.int32, (TH + 2, 1, 1), 0)
    y1 = jnp.where((rows >= 0) & (rows < H), y1, 0.0)

    # --- stage B: conv1 3x3 + act on rows [r0, r0+TH) (bf16 MXU inputs).
    y2 = _activate(_conv3x3_rows(y1.astype(jnp.bfloat16), wb_ref, bb_ref,
                                 W=W, C=C), act)

    if shortcut:
        y2 = y2 + x_mid.astype(jnp.float32)

    o_ref[...] = y2.astype(o_ref.dtype)


# ---------------------------------------------------------------------------
# One-time (model-load time) parameter folding — not in the per-call path.
# ---------------------------------------------------------------------------
def _fold_conv_bn(w_oihw, gamma, beta, mean, var, eps=1e-5):
    scale = gamma / jnp.sqrt(var + eps)                 # (O,)
    return w_oihw * scale[:, None, None, None], beta - mean * scale


def prepare_block_params(p, eps=1e-5):
    """Fold BN, merge RepVGG branches, pack W-taps along K, convert to bf16."""
    w_d, b_d = _fold_conv_bn(p['rep_dense_w'], p['rep_dense_gamma'],
                             p['rep_dense_beta'], p['rep_dense_mean'],
                             p['rep_dense_var'], eps)
    w_1, b_1 = _fold_conv_bn(p['rep_1x1_w'], p['rep_1x1_gamma'],
                             p['rep_1x1_beta'], p['rep_1x1_mean'],
                             p['rep_1x1_var'], eps)
    # RepVGG merge: 1x1 branch == 3x3 kernel with the 1x1 tap at the center.
    w_rep = w_d + jnp.pad(w_1, ((0, 0), (0, 0), (1, 1), (1, 1)))
    b_rep = b_d + b_1

    w_c1, b_c1 = _fold_conv_bn(p['conv1_w'], p['conv1_gamma'], p['conv1_beta'],
                               p['conv1_mean'], p['conv1_var'], eps)
    cout = w_rep.shape[0]

    def pack(w_oihw):
        # OIHW -> HWIO -> (kh, kw*Cin + cin, cout): the three column taps are
        # stacked along K so the kernel contracts K = 3*Cin per MXU matmul.
        w_hwio = jnp.transpose(w_oihw, (2, 3, 1, 0))
        kh, kw, cin, co = w_hwio.shape
        return w_hwio.reshape(kh, kw * cin, co).astype(jnp.bfloat16)

    return dict(
        w_rep=pack(w_rep),
        b_rep=b_rep.reshape(1, cout).astype(jnp.float32),
        w_c1=pack(w_c1),
        b_c1=b_c1.reshape(1, cout).astype(jnp.float32),
    )


# ---------------------------------------------------------------------------
# Public wrapper (PyTorch-compatible NCHW in / NCHW bf16 out).
# ---------------------------------------------------------------------------
def _pick_tile_rows(h, w, c, max_acc_bytes=96 * 1024):
    """Largest divisor of H whose f32 row-tile accumulator stays vreg-sized."""
    divisors = [d for d in range(2, h + 1) if h % d == 0]
    if not divisors:
        return h
    fitting = [d for d in divisors if d * w * c * 4 <= max_acc_bytes]
    return max(fitting) if fitting else min(divisors)


def basic_block_3x3_reverse(x_nchw, folded, *, act='relu', shortcut=True,
                            tile_rows=None):
    n, c, h, w = x_nchw.shape
    th = tile_rows if tile_rows is not None else _pick_tile_rows(h, w, c)
    assert h % th == 0, "tile_rows must divide H"
    assert th >= 2 or th == h, "tile_rows must be >= 2 (2-row halo) or == H"
    nt = h // th

    # TODO(synk): keep the surrounding network in NHWC so these two transposes
    #             (full HBM round trips) disappear.
    x = jnp.transpose(x_nchw, (0, 2, 3, 1)).astype(jnp.bfloat16)    # NHWC bf16

    kernel = functools.partial(_basic_block_kernel, H=h, W=w, C=c, TH=th,
                               act=act, shortcut=shortcut)

    # Advisory cost estimate for the XLA scheduler.
    flops = 2 * 2 * 9 * n * h * w * c * c            # 2 convs x 9 taps x MAC
    transc = 2 * n * h * w * c if act in ('silu', 'swish') else 0
    bytes_accessed = (2 * n * h * w * c * 2          # bf16 activations in+out
                      + 2 * 3 * 3 * c * c * 2        # bf16 packed weights
                      + 2 * c * 4)                   # f32 biases

    # Explicit scoped-VMEM budget: per-step working set with headroom
    # (double-buffered image block + output tile, single-buffered weights,
    #  packed-tap / accumulator temporaries).
    ws = (2 * h * w * c * 2 + 2 * th * w * c * 2
          + 2 * 3 * 3 * c * c * 2 + 2 * c * 4
          + 8 * (th + 4) * w * 3 * c * 4)
    vmem_limit = int(min(max(2 * ws, 16 * 1024 * 1024), 48 * 1024 * 1024))

    def weight_spec():
        # Constant index_map -> fetched once; Buffered(1) avoids a useless
        # second weight copy in VMEM (matters for real channel counts on v7x).
        return pl.BlockSpec((3, 3 * c, c), lambda b, t: (0, 0, 0),
                            pipeline_mode=pl.Buffered(1))

    def bias_spec():
        return pl.BlockSpec((1, c), lambda b, t: (0, 0))

    out_nhwc = pl.pallas_call(
        kernel,
        out_shape=jax.ShapeDtypeStruct((n, h, w, c), jnp.bfloat16),
        grid_spec=pltpu.PrefetchScalarGridSpec(
            num_scalar_prefetch=0,
            grid=(n, nt),
            in_specs=[
                pl.BlockSpec((None, h, w, c), lambda b, t: (b, 0, 0, 0)),   # x
                weight_spec(), bias_spec(),                                 # stage A
                weight_spec(), bias_spec(),                                 # stage B
            ],
            out_specs=pl.BlockSpec((None, th, w, c),
                                   lambda b, t: (b, t, 0, 0)),
        ),
        compiler_params=pltpu.CompilerParams(
            dimension_semantics=("parallel", "parallel"),
            vmem_limit_bytes=vmem_limit),
        cost_estimate=pl.CostEstimate(flops=flops, transcendentals=transc,
                                      bytes_accessed=bytes_accessed),
    )(x, folded['w_rep'], folded['b_rep'], folded['w_c1'], folded['b_c1'])

    return jnp.transpose(out_nhwc, (0, 3, 1, 2))


# ---------------------------------------------------------------------------
# Pure-JAX f32 reference mirroring the PyTorch module graph.
# ---------------------------------------------------------------------------
def _reference(x, p, *, act='relu', shortcut=True, eps=1e-5):
    def conv_bn(x, w, gamma, beta, mean, var, pad):
        y = lax.conv_general_dilated(
            x, w, (1, 1), [(pad, pad), (pad, pad)],
            dimension_numbers=('NCHW', 'OIHW', 'NCHW'))
        scale = (gamma / jnp.sqrt(var + eps)).reshape(1, -1, 1, 1)
        bias = (beta - mean * gamma / jnp.sqrt(var + eps)).reshape(1, -1, 1, 1)
        return y * scale + bias

    def activate(y):
        if act == 'relu':
            return jnp.maximum(y, 0.0)
        if act in ('silu', 'swish'):
            return y * jax.nn.sigmoid(y)
        if act == 'lrelu':
            return jnp.where(y > 0, y, 0.1 * y)
        if act == 'hardsigmoid':
            return jnp.clip(y / 6.0 + 0.5, 0.0, 1.0)
        return y

    y = conv_bn(x, p['rep_dense_w'], p['rep_dense_gamma'], p['rep_dense_beta'],
                p['rep_dense_mean'], p['rep_dense_var'], 1) \
        + conv_bn(x, p['rep_1x1_w'], p['rep_1x1_gamma'], p['rep_1x1_beta'],
                  p['rep_1x1_mean'], p['rep_1x1_var'], 0)
    y = activate(y)
    y = activate(conv_bn(y, p['conv1_w'], p['conv1_gamma'], p['conv1_beta'],
                         p['conv1_mean'], p['conv1_var'], 1))
    return x + y if shortcut else y


if __name__ == "__main__":
    # BasicBlock_3x3_Reverse(ch_in=128, ch_out=128, act='relu', shortcut=True).
    # C=128 keeps the K-packed MXU contraction lane-aligned and actually
    # exercises real-channel-count behaviour (the review noted C=4 does not);
    # spatial/batch stay small: (2, 128, 16, 16).
    N, C, H, W = 2, 128, 16, 16
    ACT = 'relu'

    key = jax.random.PRNGKey(0)
    keys = jax.random.split(key, 16)

    def normal(k, shape, s=1.0):
        return jax.random.normal(k, shape, jnp.float32) * s

    def uniform(k, shape):
        return jax.random.uniform(k, shape, jnp.float32, 0.5, 1.5)

    WS = 0.03   # small weight scale keeps bf16-vs-f32 comparison well inside tol
    raw = dict(
        rep_dense_w=normal(keys[0], (C, C, 3, 3), WS),
        rep_dense_gamma=uniform(keys[1], (C,)),
        rep_dense_beta=normal(keys[2], (C,), 0.1),
        rep_dense_mean=normal(keys[3], (C,), 0.1),
        rep_dense_var=uniform(keys[4], (C,)),
        rep_1x1_w=normal(keys[5], (C, C, 1, 1), WS),
        rep_1x1_gamma=uniform(keys[6], (C,)),
        rep_1x1_beta=normal(keys[7], (C,), 0.1),
        rep_1x1_mean=normal(keys[8], (C,), 0.1),
        rep_1x1_var=uniform(keys[9], (C,)),
        conv1_w=normal(keys[10], (C, C, 3, 3), WS),
        conv1_gamma=uniform(keys[11], (C,)),
        conv1_beta=normal(keys[12], (C,), 0.1),
        conv1_mean=normal(keys[13], (C,), 0.1),
        conv1_var=uniform(keys[14], (C,)),
    )
    x = normal(keys[15], (N, C, H, W))

    folded = prepare_block_params(raw)            # one-time weight folding
    # tile_rows=4 -> grid (2, 4): exercises first / interior / last row tiles.
    out = basic_block_3x3_reverse(x, folded, act=ACT, shortcut=True,
                                  tile_rows=4)
    out = jax.block_until_ready(out)

    ref = _reference(x, raw, act=ACT, shortcut=True)
    assert out.shape == (N, C, H, W)
    out_f32 = out.astype(jnp.float32)
    max_err = jnp.max(jnp.abs(out_f32 - ref))
    # Kernel uses bf16 activations / intermediates / output (f32 MXU accum)
    # vs an end-to-end f32 reference -> loose-ish tolerance by design.
    assert jnp.allclose(out_f32, ref, atol=1e-1, rtol=5e-2), \
        f"max abs err {max_err}"

    print("KERNEL_OK")
</pallas_src>

<mosaic_0001>
module attributes {stable_mosaic.version = 11 : i64} {
  func.func @_basic_block_kernel(%arg0: i32, %arg1: i32, %arg2: memref<1x16x16x128xbf16, #tpu.memory_space<vmem>>, %arg3: memref<3x384x128xbf16, #tpu.memory_space<vmem>>, %arg4: memref<1x128xf32, #tpu.memory_space<vmem>>, %arg5: memref<3x384x128xbf16, #tpu.memory_space<vmem>>, %arg6: memref<1x128xf32, #tpu.memory_space<vmem>>, %arg7: memref<1x4x16x128xbf16, #tpu.memory_space<vmem>>) attributes {dimension_semantics = [#tpu.dimension_semantics<parallel>, #tpu.dimension_semantics<parallel>], iteration_bounds = array<i64: 2, 4>, scalar_prefetch = 0 : i64, scratch_operands = 0 : i64, tpu.core_type = #tpu.core_type<tc>, window_params = [{transform_indices = @transform_0, window_bounds = array<i64: 1, 16, 16, 128>}, {pipeline_mode = #tpu.pipeline_mode<synchronous>, transform_indices = @transform_1, window_bounds = array<i64: 3, 384, 128>}, {pipeline_mode = #tpu.pipeline_mode<synchronous>, transform_indices = @transform_2, window_bounds = array<i64: 1, 128>}, {pipeline_mode = #tpu.pipeline_mode<synchronous>, transform_indices = @transform_3, window_bounds = array<i64: 3, 384, 128>}, {pipeline_mode = #tpu.pipeline_mode<synchronous>, transform_indices = @transform_4, window_bounds = array<i64: 1, 128>}, {transform_indices = @transform_5, window_bounds = array<i64: 1, 4, 16, 128>}]} {
    %c4_i32 = arith.constant 4 : i32
    %0 = arith.muli %arg1, %c4_i32 : i32
    %1 = tpu.assume_multiple %0, 4 : i32
    %c0 = arith.constant 0 : index
    %2 = arith.index_cast %1 : i32 to index
    %c0_0 = arith.constant 0 : index
    %c0_1 = arith.constant 0 : index
    %3 = vector.load %arg2[%c0, %2, %c0_0, %c0_1] : memref<1x16x16x128xbf16, #tpu.memory_space<vmem>>, vector<1x4x16x128xbf16>
    %4 = vector.shape_cast %3 : vector<1x4x16x128xbf16> to vector<4x16x128xbf16>
    %c2_i32 = arith.constant 2 : i32
    %5 = arith.subi %1, %c2_i32 : i32
    %c0_i32 = arith.constant 0 : i32
    %6 = arith.maxsi %5, %c0_i32 : i32
    %c0_2 = arith.constant 0 : index
    %7 = arith.index_cast %6 : i32 to index
    %c0_3 = arith.constant 0 : index
    %c0_4 = arith.constant 0 : index
    %8 = vector.load %arg2[%c0_2, %7, %c0_3, %c0_4] : memref<1x16x16x128xbf16, #tpu.memory_space<vmem>>, vector<1x2x16x128xbf16>
    %9 = vector.shape_cast %8 : vector<1x2x16x128xbf16> to vector<2x16x128xbf16>
    %c4_i32_5 = arith.constant 4 : i32
    %10 = arith.addi %1, %c4_i32_5 : i32
    %c14_i32 = arith.constant 14 : i32
    %11 = arith.minsi %10, %c14_i32 : i32
    %c0_6 = arith.constant 0 : index
    %12 = arith.index_cast %11 : i32 to index
    %c0_7 = arith.constant 0 : index
    %c0_8 = arith.constant 0 : index
    %13 = vector.load %arg2[%c0_6, %12, %c0_7, %c0_8] : memref<1x16x16x128xbf16, #tpu.memory_space<vmem>>, vector<1x2x16x128xbf16>
    %14 = vector.shape_cast %13 : vector<1x2x16x128xbf16> to vector<2x16x128xbf16>
    %cst = arith.constant 0.000000e+00 : bf16
    %15 = vector.broadcast %cst : bf16 to vector<2x16x128xbf16>
    %c0_i32_9 = arith.constant 0 : i32
    %16 = arith.cmpi sgt, %arg1, %c0_i32_9 : i32
    %17 = arith.select %16, %9, %15 : vector<2x16x128xbf16>
    %c3_i32 = arith.constant 3 : i32
    %18 = arith.cmpi slt, %arg1, %c3_i32 : i32
    %19 = arith.select %18, %14, %15 : vector<2x16x128xbf16>
    %20 = tpu.concatenate %17, %4, %19 in 0 : vector<2x16x128xbf16>, vector<4x16x128xbf16>, vector<2x16x128xbf16> -> vector<8x16x128xbf16>
    %cst_10 = arith.constant 0.000000e+00 : bf16
    %21 = vector.broadcast %cst_10 : bf16 to vector<8x1x128xbf16>
    %22 = vector.extract_strided_slice %20 {offsets = [0, 0, 0], sizes = [8, 15, 128], strides = [1, 1, 1]} : vector<8x16x128xbf16> to vector<8x15x128xbf16>
    %23 = tpu.concatenate %21, %22 in 1 : vector<8x1x128xbf16>, vector<8x15x128xbf16> -> vector<8x16x128xbf16>
    %24 = vector.extract_strided_slice %20 {offsets = [0, 1, 0], sizes = [8, 15, 128], strides = [1, 1, 1]} : vector<8x16x128xbf16> to vector<8x15x128xbf16>
    %25 = tpu.concatenate %24, %21 in 1 : vector<8x15x128xbf16>, vector<8x1x128xbf16> -> vector<8x16x128xbf16>
    %26 = tpu.concatenate %23, %20, %25 in 2 : vector<8x16x128xbf16>, vector<8x16x128xbf16>, vector<8x16x128xbf16> -> vector<8x16x384xbf16>
    %c0_11 = arith.constant 0 : index
    %c0_12 = arith.constant 0 : index
    %27 = vector.load %arg4[%c0_11, %c0_12] : memref<1x128xf32, #tpu.memory_space<vmem>>, vector<1x128xf32>
    %28 = vector.shape_cast %27 : vector<1x128xf32> to vector<1x128xf32>
    %29 = vector.broadcast %28 : vector<1x128xf32> to vector<96x128xf32>
    %30 = vector.extract_strided_slice %26 {offsets = [0, 0, 0], sizes = [6, 16, 384], strides = [1, 1, 1]} : vector<8x16x384xbf16> to vector<6x16x384xbf16>
    %31 = vector.shape_cast %30 : vector<6x16x384xbf16> to vector<96x384xbf16>
    %c0_13 = arith.constant 0 : index
    %c0_14 = arith.constant 0 : index
    %c0_15 = arith.constant 0 : index
    %32 = vector.load %arg3[%c0_13, %c0_14, %c0_15] : memref<3x384x128xbf16, #tpu.memory_space<vmem>>, vector<1x384x128xbf16>
    %33 = vector.shape_cast %32 : vector<1x384x128xbf16> to vector<384x128xbf16>
    %cst_16 = arith.constant dense<0.000000e+00> : vector<96x128xf32>
    %34 = tpu.matmul %31, %33, %cst_16 {dimension_numbers = #tpu.dot_dimension_numbers<[1], [0], [0], [1], [0, 0, 1, 1], [], []>} : vector<96x384xbf16>, vector<384x128xbf16>, vector<96x128xf32> -> vector<96x128xf32>
    %35 = arith.addf %29, %34 : vector<96x128xf32>
    %36 = vector.extract_strided_slice %26 {offsets = [1, 0, 0], sizes = [6, 16, 384], strides = [1, 1, 1]} : vector<8x16x384xbf16> to vector<6x16x384xbf16>
    %37 = vector.shape_cast %36 : vector<6x16x384xbf16> to vector<96x384xbf16>
    %c1 = arith.constant 1 : index
    %c0_17 = arith.constant 0 : index
    %c0_18 = arith.constant 0 : index
    %38 = vector.load %arg3[%c1, %c0_17, %c0_18] : memref<3x384x128xbf16, #tpu.memory_space<vmem>>, vector<1x384x128xbf16>
    %39 = vector.shape_cast %38 : vector<1x384x128xbf16> to vector<384x128xbf16>
    %cst_19 = arith.constant dense<0.000000e+00> : vector<96x128xf32>
    %40 = tpu.matmul %37, %39, %cst_19 {dimension_numbers = #tpu.dot_dimension_numbers<[1], [0], [0], [1], [0, 0, 1, 1], [], []>} : vector<96x384xbf16>, vector<384x128xbf16>, vector<96x128xf32> -> vector<96x128xf32>
    %41 = arith.addf %35, %40 : vector<96x128xf32>
    %42 = vector.extract_strided_slice %26 {offsets = [2, 0, 0], sizes = [6, 16, 384], strides = [1, 1, 1]} : vector<8x16x384xbf16> to vector<6x16x384xbf16>
    %43 = vector.shape_cast %42 : vector<6x16x384xbf16> to vector<96x384xbf16>
    %c2 = arith.constant 2 : index
    %c0_20 = arith.constant 0 : index
    %c0_21 = arith.constant 0 : index
    %44 = vector.load %arg3[%c2, %c0_20, %c0_21] : memref<3x384x128xbf16, #tpu.memory_space<vmem>>, vector<1x384x128xbf16>
    %45 = vector.shape_cast %44 : vector<1x384x128xbf16> to vector<384x128xbf16>
    %cst_22 = arith.constant dense<0.000000e+00> : vector<96x128xf32>
    %46 = tpu.matmul %43, %45, %cst_22 {dimension_numbers = #tpu.dot_dimension_numbers<[1], [0], [0], [1], [0, 0, 1, 1], [], []>} : vector<96x384xbf16>, vector<384x128xbf16>, vector<96x128xf32> -> vector<96x128xf32>
    %47 = arith.addf %41, %46 : vector<96x128xf32>
    %48 = vector.shape_cast %47 : vector<96x128xf32> to vector<6x16x128xf32>
    %cst_23 = arith.constant 0.000000e+00 : f32
    %49 = vector.broadcast %cst_23 : f32 to vector<6x16x128xf32>
    %50 = arith.maximumf %48, %49 : vector<6x16x128xf32>
    %c1_i32 = arith.constant 1 : i32
    %51 = arith.subi %1, %c1_i32 : i32
    %52 = tpu.iota {dimensions = array<i32: 0>} : vector<6x1x1xi32>
    %53 = vector.broadcast %51 : i32 to vector<6x1x1xi32>
    %54 = arith.addi %53, %52 : vector<6x1x1xi32>
    %c0_i32_24 = arith.constant 0 : i32
    %55 = vector.broadcast %c0_i32_24 : i32 to vector<6x1x1xi32>
    %56 = arith.cmpi sge, %54, %55 : vector<6x1x1xi32>
    %c16_i32 = arith.constant 16 : i32
    %57 = vector.broadcast %c16_i32 : i32 to vector<6x1x1xi32>
    %58 = arith.cmpi slt, %54, %57 : vector<6x1x1xi32>
    %59 = arith.andi %56, %58 : vector<6x1x1xi1>
    %cst_25 = arith.constant 0.000000e+00 : f32
    %60 = vector.shape_cast %59 : vector<6x1x1xi1> to vector<6x1x1xi1>
    %61 = vector.broadcast %60 : vector<6x1x1xi1> to vector<6x16x128xi1>
    %62 = vector.broadcast %cst_25 : f32 to vector<6x16x128xf32>
    %63 = arith.select %61, %50, %62 : vector<6x16x128xi1>, vector<6x16x128xf32>
    %64 = arith.truncf %63 : vector<6x16x128xf32> to vector<6x16x128xbf16>
    %cst_26 = arith.constant 0.000000e+00 : bf16
    %65 = vector.broadcast %cst_26 : bf16 to vector<6x1x128xbf16>
    %66 = vector.extract_strided_slice %64 {offsets = [0, 0, 0], sizes = [6, 15, 128], strides = [1, 1, 1]} : vector<6x16x128xbf16> to vector<6x15x128xbf16>
    %67 = tpu.concatenate %65, %66 in 1 : vector<6x1x128xbf16>, vector<6x15x128xbf16> -> vector<6x16x128xbf16>
    %68 = vector.extract_strided_slice %64 {offsets = [0, 1, 0], sizes = [6, 15, 128], strides = [1, 1, 1]} : vector<6x16x128xbf16> to vector<6x15x128xbf16>
    %69 = tpu.concatenate %68, %65 in 1 : vector<6x15x128xbf16>, vector<6x1x128xbf16> -> vector<6x16x128xbf16>
    %70 = tpu.concatenate %67, %64, %69 in 2 : vector<6x16x128xbf16>, vector<6x16x128xbf16>, vector<6x16x128xbf16> -> vector<6x16x384xbf16>
    %c0_27 = arith.constant 0 : index
    %c0_28 = arith.constant 0 : index
    %71 = vector.load %arg6[%c0_27, %c0_28] : memref<1x128xf32, #tpu.memory_space<vmem>>, vector<1x128xf32>
    %72 = vector.shape_cast %71 : vector<1x128xf32> to vector<1x128xf32>
    %73 = vector.broadcast %72 : vector<1x128xf32> to vector<64x128xf32>
    %74 = vector.extract_strided_slice %70 {offsets = [0, 0, 0], sizes = [4, 16, 384], strides = [1, 1, 1]} : vector<6x16x384xbf16> to vector<4x16x384xbf16>
    %75 = vector.shape_cast %74 : vector<4x16x384xbf16> to vector<64x384xbf16>
    %c0_29 = arith.constant 0 : index
    %c0_30 = arith.constant 0 : index
    %c0_31 = arith.constant 0 : index
    %76 = vector.load %arg5[%c0_29, %c0_30, %c0_31] : memref<3x384x128xbf16, #tpu.memory_space<vmem>>, vector<1x384x128xbf16>
    %77 = vector.shape_cast %76 : vector<1x384x128xbf16> to vector<384x128xbf16>
    %cst_32 = arith.constant dense<0.000000e+00> : vector<64x128xf32>
    %78 = tpu.matmul %75, %77, %cst_32 {dimension_numbers = #tpu.dot_dimension_numbers<[1], [0], [0], [1], [0, 0, 1, 1], [], []>} : vector<64x384xbf16>, vector<384x128xbf16>, vector<64x128xf32> -> vector<64x128xf32>
    %79 = arith.addf %73, %78 : vector<64x128xf32>
    %80 = vector.extract_strided_slice %70 {offsets = [1, 0, 0], sizes = [4, 16, 384], strides = [1, 1, 1]} : vector<6x16x384xbf16> to vector<4x16x384xbf16>
    %81 = vector.shape_cast %80 : vector<4x16x384xbf16> to vector<64x384xbf16>
    %c1_33 = arith.constant 1 : index
    %c0_34 = arith.constant 0 : index
    %c0_35 = arith.constant 0 : index
    %82 = vector.load %arg5[%c1_33, %c0_34, %c0_35] : memref<3x384x128xbf16, #tpu.memory_space<vmem>>, vector<1x384x128xbf16>
    %83 = vector.shape_cast %82 : vector<1x384x128xbf16> to vector<384x128xbf16>
    %cst_36 = arith.constant dense<0.000000e+00> : vector<64x128xf32>
    %84 = tpu.matmul %81, %83, %cst_36 {dimension_numbers = #tpu.dot_dimension_numbers<[1], [0], [0], [1], [0, 0, 1, 1], [], []>} : vector<64x384xbf16>, vector<384x128xbf16>, vector<64x128xf32> -> vector<64x128xf32>
    %85 = arith.addf %79, %84 : vector<64x128xf32>
    %86 = vector.extract_strided_slice %70 {offsets = [2, 0, 0], sizes = [4, 16, 384], strides = [1, 1, 1]} : vector<6x16x384xbf16> to vector<4x16x384xbf16>
    %87 = vector.shape_cast %86 : vector<4x16x384xbf16> to vector<64x384xbf16>
    %c2_37 = arith.constant 2 : index
    %c0_38 = arith.constant 0 : index
    %c0_39 = arith.constant 0 : index
    %88 = vector.load %arg5[%c2_37, %c0_38, %c0_39] : memref<3x384x128xbf16, #tpu.memory_space<vmem>>, vector<1x384x128xbf16>
    %89 = vector.shape_cast %88 : vector<1x384x128xbf16> to vector<384x128xbf16>
    %cst_40 = arith.constant dense<0.000000e+00> : vector<64x128xf32>
    %90 = tpu.matmul %87, %89, %cst_40 {dimension_numbers = #tpu.dot_dimension_numbers<[1], [0], [0], [1], [0, 0, 1, 1], [], []>} : vector<64x384xbf16>, vector<384x128xbf16>, vector<64x128xf32> -> vector<64x128xf32>
    %91 = arith.addf %85, %90 : vector<64x128xf32>
    %92 = vector.shape_cast %91 : vector<64x128xf32> to vector<4x16x128xf32>
    %cst_41 = arith.constant 0.000000e+00 : f32
    %93 = vector.broadcast %cst_41 : f32 to vector<4x16x128xf32>
    %94 = arith.maximumf %92, %93 : vector<4x16x128xf32>
    %95 = arith.extf %4 : vector<4x16x128xbf16> to vector<4x16x128xf32>
    %96 = arith.addf %94, %95 : vector<4x16x128xf32>
    %97 = arith.truncf %96 : vector<4x16x128xf32> to vector<4x16x128xbf16>
    %c0_42 = arith.constant 0 : index
    %c0_43 = arith.constant 0 : index
    %c0_44 = arith.constant 0 : index
    %c0_45 = arith.constant 0 : index
    %98 = vector.load %arg7[%c0_42, %c0_43, %c0_44, %c0_45] : memref<1x4x16x128xbf16, #tpu.memory_space<vmem>>, vector<1x4x16x128xbf16>
    %99 = vector.shape_cast %98 : vector<1x4x16x128xbf16> to vector<4x16x128xbf16>
    %100 = vector.shape_cast %97 : vector<4x16x128xbf16> to vector<1x4x16x128xbf16>
    tpu.vector_store %arg7[%c0_42, %c0_43, %c0_44, %c0_45], %100 {strides = array<i32>} : memref<1x4x16x128xbf16, #tpu.memory_space<vmem>>, vector<1x4x16x128xbf16>,
    return
  }
  func.func @transform_0(%arg0: i32, %arg1: i32) -> (i32, i32, i32, i32) {
    %c0_i32 = arith.constant 0 : i32
    %c0_i32_0 = arith.constant 0 : i32
    %c0_i32_1 = arith.constant 0 : i32
    %c0_i32_2 = arith.constant 0 : i32
    return %arg0, %c0_i32, %c0_i32_0, %c0_i32_1 : i32, i32, i32, i32
  }
  func.func @transform_1(%arg0: i32, %arg1: i32) -> (i32, i32, i32) {
    %c0_i32 = arith.constant 0 : i32
    %c0_i32_0 = arith.constant 0 : i32
    %c0_i32_1 = arith.constant 0 : i32
    %c0_i32_2 = arith.constant 0 : i32
    return %c0_i32, %c0_i32_0, %c0_i32_1 : i32, i32, i32
  }
  func.func @transform_2(%arg0: i32, %arg1: i32) -> (i32, i32) {
    %c0_i32 = arith.constant 0 : i32
    %c0_i32_0 = arith.constant 0 : i32
    %c0_i32_1 = arith.constant 0 : i32
    return %c0_i32, %c0_i32_0 : i32, i32
  }
  func.func @transform_3(%arg0: i32, %arg1: i32) -> (i32, i32, i32) {
    %c0_i32 = arith.constant 0 : i32
    %c0_i32_0 = arith.constant 0 : i32
    %c0_i32_1 = arith.constant 0 : i32
    %c0_i32_2 = arith.constant 0 : i32
    return %c0_i32, %c0_i32_0, %c0_i32_1 : i32, i32, i32
  }
  func.func @transform_4(%arg0: i32, %arg1: i32) -> (i32, i32) {
    %c0_i32 = arith.constant 0 : i32
    %c0_i32_0 = arith.constant 0 : i32
    %c0_i32_1 = arith.constant 0 : i32
    return %c0_i32, %c0_i32_0 : i32, i32
  }
  func.func @transform_5(%arg0: i32, %arg1: i32) -> (i32, i32, i32, i32) {
    %c0_i32 = arith.constant 0 : i32
    %c0_i32_0 = arith.constant 0 : i32
    %c0_i32_1 = arith.constant 0 : i32
    return %arg0, %arg1, %c0_i32, %c0_i32_0 : i32, i32, i32, i32
  }
}

</mosaic_0001>

<bundles_post_ra>
// kernel: tpu_custom_call.1
= control target key start
LH: loop header
LB: loop body
LE: loop exit
PB: predicated region body
PF: predicated region fallthrough
CT: control target
= control target key end

     0   :  { %s5100_s0 = inlined_call_operand.hbm [shape: bf16[2,16,16,128], index: 0, kind: input, shape index: {}]   ;;  %s5101_s1 = inlined_call_operand.hbm [shape: bf16[3,384,128], index: 1, kind: input, shape index: {}]   ;;  %s5102_s2 = inlined_call_operand.vmem [shape: f32[1,128], index: 2, kind: input, shape index: {}]   ;;  %s5103_s3 = inlined_call_operand.hbm [shape: bf16[3,384,128], index: 3, kind: input, shape index: {}]   ;;  %s5104_s4 = inlined_call_operand.vmem [shape: f32[1,128], index: 4, kind: input, shape index: {}]   ;;  %s5105_s5 = inlined_call_operand.hbm [shape: bf16[2,16,16,128], index: 5, kind: output, shape index: {}]  }
   0x1   :  { %5115 = sst [smem:[#allocation18_spill]] %s5101_s1 }
   0x2   :  { %5116 = sst [smem:[#allocation19_spill]] %s5103_s3 }
   0x3   :  { %5117 = sst [smem:[#allocation20_spill]] %s5105_s5 }
   0x4   :  { %10 = vsyncpa [#allocation3], 0 }
   0x5   :  { %12 = vsyncpa [#allocation3 + $0x1], 0 }
   0x6   :  { %13 = vsyncpa [#allocation6], 0 }
   0x7   :  { %14 = vsyncpa [#allocation4], 0 }
   0x8   :  { %16 = vsyncpa [#allocation4 + $0x1], 0  ;;  %s4240_s18 = smov 0   ;;  %s4242_s19 = smov 0  }
   0x9   :  { %s4244_s20 = smov 0   ;;  %s4246_s21 = smov 0  }
   0xa   :  { %s4248_s22 = smov 0   ;;  %s4250_s23 = smov 0  }
   0xb   :  { %s4252_s24 = smov 0   ;;  %s4254_s25 = smov 0  }
   0xc   :  { %s4256_s26 = smov 0   ;;  %s4258_s27 = smov 0  }
   0xd   :  { %s4260_s28 = smov 0  }
   0xe LB: > { %5118 = sst [smem:[#allocation12_spill]] %s4160_s18  ;;  %s2938_s29 = sadd.s32 4294967295, %s4200_s28   ;;  %s4200_s28 = sphi %s4260_s28, %s22_s28   ;;  %s4196_s27 = sphi %s4258_s27, %s5178_s27   ;;  %s4192_s26 = sphi %s4256_s26, %s5177_s26   ;;  %s4188_s25 = sphi %s4254_s25, %s5176_s25   ;;  %s4184_s24 = sphi %s4252_s24, %s5168_s24   ;;  %s4180_s23 = sphi %s4250_s23, %s5175_s23   ;;  %s4176_s22 = sphi %s4248_s22, %s5174_s22   ;;  %s4172_s21 = sphi %s4246_s21, %s5173_s21   ;;  %s4168_s20 = sphi %s4244_s20, %s5172_s20   ;;  %s4164_s19 = sphi %s4242_s19, %s5171_s19   ;;  %s4160_s18 = sphi %s4240_s18, %s5170_s18  }
   0xf   : > { %5119 = sst [smem:[#allocation13_spill]] %s4188_s25  ;;  %s2939_s30 = sadd.s32 4294967294, %s4200_s28  }
  0x10   : > { %5120 = sst [smem:[#allocation14_spill]] %s4192_s26  ;;  %p54_p0 = scmp.ne.s32.totalorder %s4176_s22, %s4172_s21 }
  0x11   : > { %p4296_p1 = scmp.eq.s32.totalorder %s2938_s29, 0  ;;  %p163_p2 = scmp.ne.s32.totalorder %s4168_s20, %s4164_s19 }
  0x12   : > { %p164_p4 = scmp.eq.s32.totalorder %s2938_s29, 7  ;;  %p169_p5 = scmp.ne.s32.totalorder %s4164_s19, %s4160_s18 }
  0x13   : > { %p4305_p3 = por %p4296_p1, %p54_p0  ;;  %p170_p6 = scmp.eq.s32.totalorder %s2939_s30, 7 }
  0x14   : > { %p4311_p7 = por %p164_p4, %p163_p2  ;;  %p2940_p8 = scmp.ge.s32.totalorder %s4200_s28, 1 }
  0x15   : > { %p4316_p9 = por %p170_p6, %p169_p5  ;;  %p177_p10 = scmp.lt.s32.totalorder %s4200_s28, 9 }
  0x16   : > { %s5123_s9 = scalar_select %p4311_p7, 1, 0 }
  0x17   : > { %s5125_s10 = scalar_select %p4316_p9, 1, 0 }
  0x18   : > { %5124 = sst [smem:[#allocation15_spill]] %s5123_s9  ;;  %p4321_p11 = pnand %p2940_p8, %p177_p10 }
  0x19   : > { %5126 = sst [smem:[#allocation16_spill]] %s5125_s10  ;;  %s4202_s12 = smov [#allocation5]  }
  0x1a   : > { %s189_s13 = sshll.u32 %s4202_s12, 4  ;;  %p3725_p12 = pneg %p4321_p11  ;;  %s190_s13 = int_to_ptr.vmem [resolvable:$true] %s189_s13 }
  0x1b   : > { %s4203_s15 = smov [#allocation7]   ;;  %s4007_s17 = scalar_lea.vmem %s190_s13, 9216 }
  0x1c   : > { %p4329_p13 = pnand %p3725_p12, %p4296_p1  ;;  %s205_s16 = sshll.u32 %s4203_s15, 4  ;;  %s206_s16 = int_to_ptr.vmem [resolvable:$true] %s205_s16 }
  0x1d   : > { %p4008_p2 = scmp.ne.s32.totalorder %s190_s13, %s4007_s17  ;;  %p4015_p6 = scmp.lt.s32.totalorder %s190_s13, %s190_s13 }
  0x1e   : > { %p3998_p0 = pneg %p4329_p13  ;;  %p4016_p8 = scmp.lt.s32.totalorder %s4007_s17, %s4007_s17 }
  0x20   : > { %p4010_p4 = pnand %p4008_p2, %p3998_p0  ;;  %p4017_p10 = por %p4016_p8, %p4015_p6 }
  0x22   : > { %p4011_p5 = pneg %p4010_p4 }
  0x24   : > { %p4018_p12 = pnand %p4017_p10, %p4011_p5 }
  0x26   : > { %4021 = shalt.err (!%p4018_p12)
}
  0x27   : > { %s5106_s21 = smov 64   ;;  %s5107_s29 = smov 4  }
  0x28   : > { %s5129_s1 = sld [smem:[#allocation18_spill]]  ;;  %s4033_s15 = scalar_lea.vmem %s206_s16, 9216 }
  0x29   : > { %p4034_p2 = scmp.ne.s32.totalorder %s206_s16, %s4033_s15  ;;  %p4041_p5 = scmp.lt.s32.totalorder %s206_s16, %s206_s16 }
  0x2a   : > { %p4042_p8 = scmp.lt.s32.totalorder %s4033_s15, %s4033_s15 }
  0x2b   : > { %p4036_p4 = pnand %p4034_p2, %p3998_p0 }
  0x2c   : > { %p4043_p10 = por %p4042_p8, %p4041_p5 }
  0x2d   : > { %p4037_p6 = pneg %p4036_p4 }
  0x2e   : > { %3728 = dma.hbm_to_vmem [thread:$0]  (!%p4329_p13), %s5129_s1, 9216, %s190_s13, [#allocation6], %s5106_s21, %s5106_s21, %s5107_s29  }
  0x2f   : > { %p4044_p12 = pnand %p4043_p10, %p4037_p6 }
  0x31   : > { %4047 = shalt.err (!%p4044_p12)
}
  0x32   : > { %s5130_s3 = sld [smem:[#allocation19_spill]]  ;;  %s31_s13 = sadd.s32 1, %s4192_s26 }
  0x33   : > { %s34_s14 = sadd.s32 1, %s4196_s27  ;;  %p32_p0 = scmp.ge.s32.totalorder %s31_s13, 4 }
  0x34   : > { %s41_s30 = sadd.s32 1, %s4180_s23  ;;  %p48_p2 = scmp.ne.s32.totalorder %s4180_s23, %s4176_s22 }
  0x35   : > { %p49_p4 = scmp.eq.s32.totalorder %s4200_s28, 0  ;;  %s5180_s13 = smov (%p32_p0, %s31_s13), 0 }
  0x36   : > { %5131 = sst [smem:[#allocation17_spill]] %s5180_s13  ;;  %s5182_s14 = smov (!%p32_p0, %s34_s14), %s4196_s27 }
  0x37   : > { %p4366_p6 = por %p49_p4, %p48_p2  ;;  %s149_s12 = ssub.s32 %s4192_s26, %s5180_s13 }
  0x38   : > { %3731 = dma.hbm_to_vmem [thread:$0]  (!%p4329_p13), %s5130_s3, 9216, %s206_s16, [#allocation6], %s5106_s21, %s5106_s21, %s5107_s29  }
  0x39   : > { %p36_p13 = scmp.ge.s32.totalorder %s5182_s14, 2  ;;  %p3742_p5 = scmp.lt.s32.totalorder %s4200_s28, 8 }
  0x3a   : > { %s222_s16 = sand.u32 1, %s4180_s23   ;;  %s3166_s15 = sshll.u32 %s4196_s27, 11 }
  0x3b   : > { %s5184_s14 = smov (%p36_p13, %s5182_s14), 0  ;;  %s2944_s17 = sshll.u32 %s222_s16, 7 }
  0x3c   : > { %s38_s21 = ssub.s32 %s4196_s27, %s5184_s14  ;;  %s232_s10 = scalar_lea.hbm %s5100_s0, %s3166_s15 }
  0x3d   : > { %p39_p8 = scmp.eq.s32.totalorder %s38_s21, 0  ;;  %s150_s29 = sor.u32 %s149_s12, %s38_s21 }
  0x3e   : > { %p151_p10 = scmp.eq.s32.totalorder %s150_s29, 0  ;;  %s5133_s13 = sadd.s32 1, %s4168_s20 }
  0x3f   : > { %s4383_s18 = scalar_select %p39_p8, %s4180_s23, %s41_s30  }
  0x40   : > { %s4388_s26 = scalar_select %p151_p10, %s4168_s20, %s5133_s13  }
  0x41   : > { %s226_s5 = scalar_lea.vmem [#allocation2], %s2944_s17  ;;  %p4394_p12 = pnand %p3742_p5, %p4366_p6 }
  0x42   : > { %s233_s9 = sshll.u32 %s226_s5, 4  ;;  %s223_s21 = scalar_lea.sflag [#allocation3], %s222_s16  ;;  %s234_s9 = int_to_ptr.vmem [resolvable:$true] %s233_s9 }
  0x43   : > { %p4050_p0 = pneg %p4394_p12  ;;  %s4061_s1 = scalar_lea.vmem %s234_s9, 2048 }
  0x44   : > { %p4062_p2 = scmp.ne.s32.totalorder %s234_s9, %s4061_s1  ;;  %s4206_s3 = smov [#allocation2]  }
  0x45   : > { %s4066_s29 = sshll.u32 %s4206_s3, 4  ;;  %s4067_s29 = int_to_ptr.vmem [resolvable:$false] %s4066_s29 }
  0x46   : > { %p4064_p4 = pnand %p4062_p2, %p4050_p0  ;;  %s4068_s13 = scalar_lea.vmem %s4067_s29, 4096 }
  0x47   : > { %p4069_p8 = scmp.lt.s32.totalorder %s234_s9, %s4067_s29  ;;  %p4070_p10 = scmp.lt.s32.totalorder %s4068_s13, %s4061_s1 }
  0x48   : > { %p4065_p13 = pneg %p4064_p4 }
  0x49   : > { %p4071_p9 = por %p4070_p10, %p4069_p8 }
  0x4b   : > { %p4072_p6 = pnand %p4071_p9, %p4065_p13 }
  0x4d   : > { %4075 = shalt.err (!%p4072_p6)
}
  0x4e   : > { %s5135_s5 = smov 4   ;;  %s5136_s30 = smov 64  }
  0x4f   : > { %3735 = dma.hbm_to_vmem [thread:$0]  (!%p4394_p12), %s232_s10, 2048, %s234_s9, %s223_s21, %s5136_s30, %s5136_s30, %s5135_s5  }
  0x50   : > { %245 = sbr.rel (%p4321_p11) target bundleno = 734 (0x2de), region = 40  ;;  %s247_s7 = sand.u32 (!%p4321_p11), 1, %s4176_s22  }
  0x51   : > { %s2948_s12 = sshll.u32 (!%p4321_p11), %s247_s7, 7  ;;  %s248_s16 = scalar_lea.sflag (!%p4321_p11), [#allocation3], %s247_s7 }
  0x52   : > { %s4408_s15 = scalar_lea.vmem (!%p4321_p11), [#allocation2], %s2948_s12 }
  0x55   : > { %4147 = dma.done.wait (%p4305_p3), %s248_s16, 2048  }
  0x56   : > { %4149 = vsyncadd (%p4305_p3), %s248_s16, 4294965248 }
  0x57   : > { %4151 = dma.done.wait (%p4296_p1), [#allocation6], 18432  }
  0x58   : > { %4153 = vsyncadd (%p4296_p1), [#allocation6], 4294948864  ;;  %p320_p9 = scmp.gt.s32.totalorder %s4184_s24, 0  ;;  %v3840_v0 = vld [vmem:[#allocation5 + $0x78] sm:$0xff]   ;;  %v3843_v3 = vld [vmem:[#allocation5 + $0x70] sm:$0xff]   ;;  %s4422_s8 = sshll.u32 %s4184_s24, 2 }
  0x59   : > { %v3841_v1 = vld [vmem:[#allocation5 + $0xb8] sm:$0xff]   ;;  %3203 = vmatprep.subr.bf16.mxu0 %v3840_v0  ;;  %v3844_v4 = vld [vmem:[#allocation5 + $0xb0] sm:$0xff]   ;;  %v3846_v6 = vld [vmem:[#allocation5 + $0x68] sm:$0xff]   ;;  %s2955_s6 = sadd.s32 4294967294, %s4422_s8  ;;  %vm476_vm0 = vsmask.f32 7424 }
  0x5a   : > { %s4419_s25 = scalar_select %p320_p9, 1, 0  ;;  %v3842_v2 = vld [vmem:[#allocation5 + $0x38] sm:$0xff]   ;;  %3557 = vmatprep.subr.bf16.mxu1 %v3841_v1  ;;  %v3845_v5 = vld [vmem:[#allocation5 + $0x30] sm:$0xff]   ;;  %v3847_v7 = vld [vmem:[#allocation5 + $0xa8] sm:$0xff]   ;;  %vm475_vm1 = vcmask 1047552  }
  0x5b   : > { %3204 = vmatpush3.bf16.msra.mxu0 %v3842_v2  ;;  %3558 = vmatpush3.bf16.msra.mxu1 %v3841_v1  ;;  %v3848_v8 = vld [vmem:[#allocation5 + $0x28] sm:$0xff]   ;;  %v3849_v9 = vld [vmem:[#allocation5 + $0x60] sm:$0xff]   ;;  %p301_p1 = scmp.gt.s32.totalorder %s2955_s6, 0  ;;  %v3852_v12 = vld [vmem:[#allocation5 + $0x58] sm:$0xff]   ;;  %vm441_vm2 = vsmask.f32 256 }
  0x5c   : > { %3205 = vmatprep.subr.bf16.mxu0 %v3843_v3  ;;  %3559 = vmatprep.subr.bf16.mxu1 %v3844_v4  ;;  %v3850_v10 = vld [vmem:[#allocation5 + $0xa0] sm:$0xff]   ;;  %v3853_v13 = vld [vmem:[#allocation5 + $0x98] sm:$0xff]   ;;  %v3855_v15 = vld [vmem:[#allocation5 + $0x50] sm:$0xff]   ;;  %v322_v18 = vstv %s4419_s25  ;;  %vm440_vm3 = vcmask 1040384   ;;  %s3168_s11 = sshll.u32 %s4184_s24, 5  ;;  %s310_s21 = sadd.s32 4, %s4422_s8 }
  0x5d   : > { %v3851_v11 = vld [vmem:[#allocation5 + $0x20] sm:$0xff]   ;;  %s5186_s6 = smov (!%p301_p1, %s2955_s6), 0  ;;  %v3854_v14 = vld [vmem:[#allocation5 + $0x18] sm:$0xff]   ;;  %v3856_v16 = vld [vmem:[#allocation5 + $0x90] sm:$0xff]   ;;  %vm4427_vm4 = vcmp.eq.s32.totalorder %v322_v18, 1  ;;  %s4459_s17 = scalar_lea.vmem %s4408_s15, %s3168_s11 [#allocation2] }
  0x5e   : > { %s3169_s9 = sshll.u32 %s5186_s6, 3  ;;  %v3857_v17 = vld [vmem:[#allocation5 + $0x10] sm:$0xff]   ;;  %v3858_v19 = vld [vmem:[#allocation5 + $0x48] sm:$0xff]   ;;  %v3861_v23 = vld [vmem:[#allocation5 + $0x40] sm:$0xff]   ;;  %p311_p3 = scmp.lt.s32.totalorder %s310_s21, 14 }
  0x5f   : > { %3206 = vmatpush3.bf16.msra.mxu0 %v3845_v5  ;;  %3560 = vmatpush3.bf16.msra.mxu1 %v3844_v4  ;;  %v3859_v20 = vld [vmem:[#allocation5 + $0x88] sm:$0xff]   ;;  %s305_s10 = scalar_lea.vmem %s4408_s15, %s3169_s9 [#allocation2]  ;;  %v3862_v27 = vld [vmem:[#allocation5 + $0x80] sm:$0xff]   ;;  %v3864_v38 = vld [vmem:[#allocation5 + $0x138] sm:$0xff]   ;;  %p328_p11 = scmp.lt.s32.totalorder %s4184_s24, 3 }
  0x60   : > { %3207 = vmatprep.subr.bf16.mxu0 %v3846_v6  ;;  %3561 = vmatprep.subr.bf16.mxu1 %v3847_v7  ;;  %v3860_v21 = vld [vmem:[#allocation5 + $0x8] sm:$0xff]   ;;  %v306_v24 = vld [vmem:[%s305_s10] sm:$0xf]  ;;  %v307_v25 = vld [vmem:[%s305_s10 + $0x4] sm:$0xf]  ;;  %s5188_s21 = smov (!%p311_p3, %s310_s21), 14 }
  0x61   : > { %v308_v26 = vld [vmem:[%s305_s10 + $0x8] sm:$0xf]  ;;  %v309_v28 = vld [vmem:[%s305_s10 + $0xc] sm:$0xf]  ;;  %v324_v29 = vsel %vm4427_vm4, %v306_v24, 0  ;;  %v325_v30 = vsel %vm4427_vm4, %v307_v25, 0  ;;  %vm4446_vm5 = vmand %vm475_vm1, %vm476_vm0 }
  0x62   : > { %v326_v31 = vsel %vm4427_vm4, %v308_v26, 0  ;;  %v3863_v32 = vld [vmem:[#allocation5] sm:$0xff]   ;;  %v327_v33 = vsel %vm4427_vm4, %v309_v28, 0  ;;  %v2960_v34 = vcombine.low %v324_v29, %v325_v30  ;;  %v3865_v39 = vld [vmem:[#allocation5 + $0x178] sm:$0xff]   ;;  %vm4452_vm6 = vmand %vm440_vm3, %vm441_vm2  ;;  %s329_s1 = scalar_select %p328_p11, 1, 0 }
  0x63   : > { %3208 = vmatpush3.bf16.msra.mxu0 %v3848_v8  ;;  %3562 = vmatpush3.bf16.msra.mxu1 %v3847_v7  ;;  %v4440_v35 = vcombine.low %v326_v31, %v327_v33  ;;  %v3866_v49 = vld [vmem:[#allocation5 + $0xf8] sm:$0xff]   ;;  %v3869_v52 = vld [vmem:[#allocation5 + $0x170] sm:$0xff]   ;;  %v4466_v56 = vld [vmem:[%s4459_s17] sm:$0xff]   ;;  %s3170_s3 = sshll.u32 %s5188_s21, 3  ;;  %s3041_s30 = sadd.s32 4294967295, %s4422_s8 }
  0x64   : > { %3209 = vmatprep.subr.bf16.mxu0 %v3849_v9  ;;  %3563 = vmatprep.subr.bf16.mxu1 %v3850_v10  ;;  %v377_v36 = vshrl.u32 %v2960_v34, 16  ;;  %v380_v37 = vshll.u32 %v2960_v34, 16  ;;  %v3867_v55 = vld [vmem:[#allocation5 + $0x130] sm:$0xff]   ;;  %v4469_v57 = vld [vmem:[%s4459_s17 + $0x8] sm:$0xff]   ;;  %v391_v62 = vshrl.u32 %v4466_v56, 16  ;;  %v394_v63 = vshll.u32 %v4466_v56, 16  ;;  %s4539_s29 = scalar_lea.vmem %s4408_s15, %s3170_s3 [#allocation2] }
  0x65   : > { %v384_v40 = vshrl.u32 %v4440_v35, 16  ;;  %v387_v41 = vshll.u32 %v4440_v35, 16  ;;  %725 = vmatprep.mubr.bf16.mxu0 %v2960_v34  ;;  %v3868_v59 = vld [vmem:[#allocation5 + $0xf0] sm:$0xff]   ;;  %v3875_v61 = vld [vmem:[#allocation5 + $0x168] sm:$0xff]   ;;  %v398_v0 = vshrl.u32 %v4469_v57, 16  ;;  %v401_v1 = vshll.u32 %v4469_v57, 16 }
  0x66   : > { %v451_v42 = vrot.slane %v380_v37, 1  ;;  %v379_v44 = vrot.slane %v377_v36, 7  ;;  %v3870_v2 = vld [vmem:[#allocation5 + $0x128] sm:$0xff]   ;;  %v455_v4 = vrot.slane %v394_v63, 1  ;;  %v393_v7 = vrot.slane %v391_v62, 7  ;;  %v3878_v24 = vld [vmem:[#allocation5 + $0xd8] sm:$0xff]  }
  0x67   : > { %3210 = vmatpush3.bf16.msra.mxu0 %v3851_v11  ;;  %3564 = vmatpush3.bf16.msra.mxu1 %v3850_v10  ;;  %v453_v46 = vrot.slane %v387_v41, 1  ;;  %v386_v50 = vrot.slane %v384_v40, 7  ;;  %v3871_v3 = vld [vmem:[#allocation5 + $0xe8] sm:$0xff]   ;;  %v457_v5 = vrot.slane %v401_v1, 1  ;;  %v3874_v10 = vld [vmem:[#allocation5 + $0x120] sm:$0xff]   ;;  %v4486_v11 = vld [vmem:[%s4459_s17 + $0x10] sm:$0xff]  }
  0x68   : > { %3211 = vmatprep.subr.bf16.mxu0 %v3852_v12  ;;  %3565 = vmatprep.subr.bf16.mxu1 %v3853_v13  ;;  %v452_v47 = vor.u32 %v451_v42, %v377_v36  ;;  %v382_v48 = vor.u32 %v380_v37, %v379_v44  ;;  %v456_v8 = vor.u32 %v455_v4, %v391_v62  ;;  %v4489_v12 = vld [vmem:[%s4459_s17 + $0x18] sm:$0xff]   ;;  %v405_v18 = vshrl.u32 %v4486_v11, 16  ;;  %v3882_v31 = vld [vmem:[#allocation5 + $0x110] sm:$0xff]   ;;  %v3887_v44 = vld [vmem:[#allocation5 + $0x100] sm:$0xff]   ;;  %s283_s16 = sand.u32 1, %s4164_s19   ;;  %s5161_s8 = sld [smem:[#allocation13_spill]] }
  0x69   : > { %v454_v51 = vor.u32 %v453_v46, %v384_v40  ;;  %v389_v60 = vor.u32 %v387_v41, %v386_v50  ;;  %v458_v9 = vor.u32 %v457_v5, %v398_v0  ;;  %v415_v22 = vshll.u32 %v4489_v12, 16  ;;  %v3889_v34 = vld [vmem:[#allocation5 + $0x150] sm:$0xff]   ;;  %v3886_v41 = vld [vmem:[#allocation5 + $0xc8] sm:$0xff]   ;;  %v3893_v46 = vld [vmem:[#allocation5 + $0x140] sm:$0xff]   ;;  %s2951_s15 = sshll.u32 %s283_s16, 5  ;;  %s3179_s6 = sshll.u32 %s4184_s24, 3 }
  0x6a   : > { %v478_v53 = vsel %vm4446_vm5, %v452_v47, 0  ;;  %v443_v54 = vsel %vm4452_vm6, 0, %v382_v48  ;;  %v400_v26 = vrot.slane %v398_v0, 7  ;;  %v3883_v37 = vld [vmem:[#allocation5 + $0xd0] sm:$0xff]   ;;  %v407_v42 = vrot.slane %v405_v18, 7  ;;  %v3888_v47 = vld [vmem:[#allocation5 + $0xc0] sm:$0xff]  }
  0x6b   : > { %3212 = vmatpush3.bf16.msra.mxu0 %v3854_v14  ;;  %3566 = vmatpush3.bf16.msra.mxu1 %v3853_v13  ;;  %v4473_v58 = vsel %vm4446_vm5, %v454_v51, 0  ;;  %v4483_v6 = vsel %vm4452_vm6, 0, %v389_v60  ;;  %v4494_v13 = vsel %vm4446_vm5, %v456_v8, 0  ;;  %v4498_v14 = vsel %vm4446_vm5, %v458_v9, 0  ;;  %v316_v60 = vld [vmem:[%s4539_s29] sm:$0xf] }
  0x6c   : > { %3213 = vmatprep.subr.bf16.mxu0 %v3855_v15  ;;  %3567 = vmatprep.subr.bf16.mxu1 %v3856_v16  ;;  %v3879_v15 = vld [vmem:[#allocation5 + $0x160] sm:$0xff]   ;;  %v461_v28 = vrot.slane %v415_v22, 1  ;;  %v403_v33 = vor.u32 %v401_v1, %v400_v26  ;;  %v318_v8 = vld [vmem:[%s4539_s29 + $0x8] sm:$0xf]  ;;  %v319_v9 = vld [vmem:[%s4539_s29 + $0xc] sm:$0xf] }
  0x6d   : > { %3573 = vmatprep.mubr.bf16.mxu1 %v478_v53  ;;  %v3892_v53 = vld [vmem:[#allocation5 + $0x230] sm:$0xff]   ;;  %v3903_v26 = vld [vmem:[#allocation5 + $0x1e0] sm:$0xff]   ;;  %s5013_s25 = scalar_lea.vmem [#allocation8], %s2951_s15 }
  0x6e   : > { %v4528_v40 = vsel %vm4452_vm6, 0, %v403_v33  ;;  %v3905_v33 = vld [vmem:[#allocation5 + $0x1d8] sm:$0xff]   ;;  %s3162_s9 = sshll.u32 %s5161_s8, 5  ;;  %s2826_s21 = sshll.u32 %s5013_s25, 4  ;;  %s5030_s21 = int_to_ptr.vmem [resolvable:$true] %s2826_s21 }
  0x6f   : > { %3214 = vmatpush3.bf16.msra.mxu0 %v3857_v17  ;;  %3568 = vmatpush3.bf16.msra.mxu1 %v3856_v16  ;;  %v3876_v16 = vld [vmem:[#allocation5 + $0xe0] sm:$0xff]   ;;  %v396_v17 = vor.u32 %v394_v63, %v393_v7  ;;  %v3902_v7 = vld [vmem:[#allocation5 + $0x218] sm:$0xff]   ;;  %s2823_s10 = sadd.s32 %s3179_s6, %s3162_s9  ;;  %s4076_s5 = scalar_lea.vmem %s5030_s21, 512 }
  0x70   : > { %3215 = vmatprep.subr.bf16.mxu0 %v3858_v19  ;;  %3569 = vmatprep.subr.bf16.mxu1 %v3859_v20  ;;  %v408_v19 = vshll.u32 %v4486_v11, 16  ;;  %p4077_p5 = scmp.ne.s32.totalorder %s5030_s21, %s4076_s5 }
  0x72   : > { %v459_v25 = vrot.slane %v408_v19, 1  ;;  %v410_v48 = vor.u32 %v408_v19, %v407_v42  ;;  %v3899_v19 = vld [vmem:[#allocation5 + $0x1b0] sm:$0xff]   ;;  %p4078_p12 = pnand %p4077_p5, %p4311_p7 }
  0x73   : > { %3216 = vmatpush3.bf16.msra.mxu0 %v3860_v21  ;;  %3570 = vmatpush3.bf16.msra.mxu1 %v3859_v20  ;;  %v3877_v20 = vld [vmem:[#allocation5 + $0x118] sm:$0xff]   ;;  %v412_v21 = vshrl.u32 %v4489_v12, 16 }
  0x74   : > { %3217 = vmatprep.subr.bf16.mxu0 %v3861_v23  ;;  %3571 = vmatprep.subr.bf16.mxu1 %v3862_v27  ;;  %v3885_v23 = vld [vmem:[#allocation5 + $0x158] sm:$0xff]   ;;  %v460_v29 = vor.u32 %v459_v25, %v405_v18  ;;  %v4536_v50 = vsel %vm4452_vm6, 0, %v410_v48  ;;  %v3901_v25 = vld [vmem:[#allocation5 + $0x1a8] sm:$0xff]   ;;  %p4079_p0 = pneg %p4078_p12 }
  0x75   : > { %v462_v30 = vor.u32 %v461_v28, %v412_v21  ;;  %v414_v51 = vrot.slane %v412_v21, 7  ;;  %v3921_v48 = vld [vmem:[#allocation7 + $0x68] sm:$0xff]  }
  0x77   : > { %3218 = vmatpush3.bf16.msra.mxu0 %v3863_v32  ;;  %3572 = vmatpush3.bf16.msra.mxu1 %v3862_v27  ;;  %v4509_v27 = vsel %vm4452_vm6, 0, %v396_v17  ;;  %v4517_v32 = vsel %vm4446_vm5, %v460_v29, 0  ;;  %v4522_v36 = vsel %vm4446_vm5, %v462_v30, 0  ;;  %v3914_v30 = vld [vmem:[#allocation5 + $0x200] sm:$0xff]  }
  0x78   : > { %3269 = vmatprep.subr.bf16.mxu1 %v3864_v38  ;;  %3585 = vmatprep.subr.bf16.mxu0 %v3865_v39  ;;  %v3884_v38 = vld [vmem:[#allocation5 + $0x108] sm:$0xff]  }
  0x7a   : > { %726 = vmatmul.mubr.bf16.vlgmr.msra.gmra.mxu0 %v443_v54  ;;  %3574 = vmatmul.mubr.bf16.vlgmr.msra.gmra.mxu1 %v4473_v58  ;;  %v3928_v54 = vld [vmem:[#allocation7 + $0x18] sm:$0xff]  }
  0x7b   : > { %3586 = vmatpush3.bf16.msra.mxu0 %v3865_v39  ;;  %3270 = vmatpush3.bf16.msra.mxu1 %v3866_v49  ;;  %v3891_v39 = vld [vmem:[#allocation5 + $0x148] sm:$0xff]   ;;  %v3895_v49 = vld [vmem:[#allocation5 + $0x1f8] sm:$0xff]  }
  0x7c   : > { %3587 = vmatprep.subr.bf16.mxu0 %v3869_v52  ;;  %3271 = vmatprep.subr.bf16.mxu1 %v3867_v55  ;;  %v417_v55 = vor.u32 %v415_v22, %v414_v51  ;;  %v3925_v51 = vld [vmem:[#allocation7 + $0x20] sm:$0xff]  }
  0x7d   : > { %733 = vmatprep.mubr.bf16.mxu0 %v4440_v35  ;;  %3577 = vmatprep.mubr.bf16.mxu1 %v4494_v13 }
  0x7e   : > { %v4561_v1 = vsel %vm4452_vm6, 0, %v417_v55  ;;  %v3929_v55 = vld [vmem:[#allocation7 + $0xa0] sm:$0xff]  }
  0x7f   : > { %3588 = vmatpush3.bf16.msra.mxu0 %v3869_v52  ;;  %3272 = vmatpush3.bf16.msra.mxu1 %v3868_v59  ;;  %v330_v52 = vstv %s329_s1  ;;  %v3894_v59 = vld [vmem:[#allocation5 + $0x228] sm:$0xff]   ;;  %s3163_s1 = sshll.u32 %s2823_s10, 6 }
  0x80   : > { %3589 = vmatprep.subr.bf16.mxu0 %v3875_v61  ;;  %3273 = vmatprep.subr.bf16.mxu1 %v3870_v2  ;;  %vm4542_vm7 = vcmp.eq.s32.totalorder %v330_v52, 1  ;;  %v3898_v2 = vld [vmem:[#allocation5 + $0x220] sm:$0xff]   ;;  %v3926_v52 = vld [vmem:[#allocation7 + $0xa8] sm:$0xff]  }
  0x81   : > { %v332_v62 = vsel %vm4542_vm7, %v316_v60, 0  ;;  %v335_v17 = vsel %vm4542_vm7, %v319_v9, 0  ;;  %v3931_v60 = vld [vmem:[#allocation7 + $0x10] sm:$0xff]  }
  0x82   : > { %734 = vmatmul.mubr.bf16.gmra.mxu0 %v4483_v6  ;;  %3578 = vmatmul.mubr.bf16.gmra.mxu1 %v4498_v14 }
  0x83   : > { %3590 = vmatpush3.bf16.msra.mxu0 %v3875_v61  ;;  %3274 = vmatpush3.bf16.msra.mxu1 %v3871_v3  ;;  %v317_v61 = vld [vmem:[%s4539_s29 + $0x4] sm:$0xf]  ;;  %s5163_s29 = sld [smem:[#allocation20_spill]] }
  0x84   : > { %741 = vmatprep.mubr.bf16.mxu0 %v4466_v56  ;;  %3275 = vmatprep.subr.bf16.mxu1 %v3874_v10  ;;  %v333_v63 = vsel %vm4542_vm7, %v317_v61, 0  ;;  %v3897_v10 = vld [vmem:[#allocation5 + $0x1f0] sm:$0xff]   ;;  %v3932_v61 = vld [vmem:[#allocation7 + $0x98] sm:$0xff]  }
  0x85   : > { %3591 = vmatprep.subr.bf16.mxu0 %v3879_v15  ;;  %3581 = vmatprep.mubr.bf16.mxu1 %v4517_v32  ;;  %v4557_v0 = vcombine.low %v332_v62, %v333_v63  ;;  %v3933_v62 = vld [vmem:[#allocation7 + $0x48] sm:$0xff]  }
  0x86   : > { %v3934_v63 = vld [vmem:[#allocation7 + $0x8] sm:$0xff]  }
  0x87   : > { %3592 = vmatpush3.bf16.msra.mxu0 %v3879_v15  ;;  %3276 = vmatpush3.bf16.msra.mxu1 %v3876_v16  ;;  %v422_v3 = vshll.u32 %v4557_v0, 16  ;;  %v419_v4 = vshrl.u32 %v4557_v0, 16  ;;  %v334_v16 = vsel %vm4542_vm7, %v318_v8, 0 }
  0x88   : > { %3593 = vmatprep.subr.bf16.mxu0 %v3885_v23  ;;  %3277 = vmatprep.subr.bf16.mxu1 %v3877_v20  ;;  %v3900_v20 = vld [vmem:[#allocation5 + $0x1e8] sm:$0xff]  }
  0x89   : > { %v463_v5 = vrot.slane %v422_v3, 1  ;;  %v421_v15 = vrot.slane %v419_v4, 7  ;;  %s5035_s13 = scalar_lea.hbm %s5163_s29, %s3163_s1 }
  0x8a   : > { %742 = vmatmul.mubr.bf16.gmra.mxu0 %v4509_v27  ;;  %3582 = vmatmul.mubr.bf16.gmra.mxu1 %v4522_v36 }
  0x8b   : > { %749 = vmatprep.mubr.bf16.mxu0 %v4469_v57  ;;  %3278 = vmatpush3.bf16.msra.mxu1 %v3878_v24  ;;  %v464_v18 = vor.u32 %v463_v5, %v419_v4  ;;  %v424_v22 = vor.u32 %v422_v3, %v421_v15  ;;  %v3910_v24 = vld [vmem:[#allocation5 + $0x208] sm:$0xff]   ;;  %v3939_v4 = vld [vmem:[#allocation7 + $0x138] sm:$0xff]   ;;  %v3941_v5 = vld [vmem:[#allocation7 + $0x80] sm:$0xff]  }
  0x8c   : > { %3594 = vmatpush3.bf16.msra.mxu0 %v3885_v23  ;;  %3279 = vmatprep.subr.bf16.mxu1 %v3882_v31  ;;  %v4579_v23 = vcombine.low %v334_v16, %v335_v17  ;;  %v3904_v31 = vld [vmem:[#allocation5 + $0x1a0] sm:$0xff]   ;;  %v3938_v3 = vld [vmem:[#allocation7 + $0x88] sm:$0xff]  }
  0x8d   : > { %3595 = vmatprep.subr.bf16.mxu0 %v3889_v34  ;;  %1092 = vmatprep.mubr.bf16.mxu1 %v4440_v35  ;;  %v3890_v35 = vld [vmem:[#allocation5 + $0x238] sm:$0xff]   ;;  %v484_v21 = vsel %vm4446_vm5, %v464_v18, 0  ;;  %v449_v28 = vsel %vm4452_vm6, 0, %v424_v22 }
  0x8e   : > { %v429_v29 = vshll.u32 %v4579_v23, 16  ;;  %v426_v42 = vshrl.u32 %v4579_v23, 16 }
  0x8f   : > { %3280 = vmatpush3.bf16.msra.mxu1 %v3883_v37  ;;  %v3908_v37 = vld [vmem:[#allocation5 + $0x1d0] sm:$0xff]  }
  0x90   : > { %3596 = vmatpush3.bf16.msra.mxu0 %v3889_v34  ;;  %3281 = vmatprep.subr.bf16.mxu1 %v3884_v38  ;;  %v3907_v34 = vld [vmem:[#allocation5 + $0x198] sm:$0xff]   ;;  %v3909_v38 = vld [vmem:[#allocation5 + $0x190] sm:$0xff]  }
  0x91   : > { %3597 = vmatprep.subr.bf16.mxu0 %v3891_v39 }
  0x92   : > { %750 = vmatmul.mubr.bf16.gmra.mxu0 %v4528_v40 }
  0x93   : > { %757 = vmatprep.mubr.bf16.mxu0 %v4486_v11  ;;  %3282 = vmatpush3.bf16.msra.mxu1 %v3886_v41  ;;  %v3912_v41 = vld [vmem:[#allocation5 + $0x188] sm:$0xff]  }
  0x94   : > { %3598 = vmatpush3.bf16.msra.mxu0 %v3891_v39  ;;  %3283 = vmatprep.subr.bf16.mxu1 %v3887_v44  ;;  %v3911_v39 = vld [vmem:[#allocation5 + $0x1c8] sm:$0xff]   ;;  %v465_v44 = vrot.slane %v429_v29, 1 }
  0x95   : > { %3599 = vmatprep.subr.bf16.mxu0 %v3893_v46 }
  0x97   : > { %3284 = vmatpush3.bf16.msra.mxu1 %v3888_v47  ;;  %v3915_v47 = vld [vmem:[#allocation5 + $0x180] sm:$0xff]  }
  0x98   : > { %3600 = vmatpush3.bf16.msra.mxu0 %v3893_v46  ;;  %3613 = vmatprep.subr.bf16.mxu1 %v3890_v35  ;;  %v3913_v46 = vld [vmem:[#allocation5 + $0x1c0] sm:$0xff]  }
  0x99   : > { %3335 = vmatprep.subr.bf16.mxu0 %v3895_v49  ;;  %v3923_v49 = vld [vmem:[#allocation7 + $0xb0] sm:$0xff]  }
  0x9a   : > { %758 = vmatmul.mubr.bf16.gmra.mxu0 %v4536_v50  ;;  %1093 = vmatmul.mubr.bf16.vlgmr.msra.gmra.mxu1 %v4483_v6  ;;  %v3896_v6 = vld [vmem:[#allocation5 + $0x1b8] sm:$0xff]  }
  0x9b   : > { %765 = vmatprep.mubr.bf16.mxu0 %v4489_v12  ;;  %3614 = vmatpush3.bf16.msra.mxu1 %v3890_v35  ;;  %v3922_v35 = vld [vmem:[#allocation7 + $0x28] sm:$0xff]  }
  0x9c   : > { %1100 = vmatprep.mubr.bf16.mxu1 %v4466_v56  ;;  %3615 = vmatprep.subr.bf16.mxu1 %v3892_v53 }
  0x9f   : > { %3616 = vmatpush3.bf16.msra.mxu1 %v3892_v53  ;;  %v3927_v53 = vld [vmem:[#allocation7 + $0x58] sm:$0xff]  }
  0xa0   : > { %3617 = vmatprep.subr.bf16.mxu1 %v3894_v59 }
  0xa2   : > { %766 = vmatmul.mubr.bf16.gmra.mxu0 %v4561_v1  ;;  %1101 = vmatmul.mubr.bf16.gmra.mxu1 %v4509_v27 }
  0xa3   : > { %3601 = vmatprep.mubr.bf16.mxu0 %v4473_v58  ;;  %3618 = vmatpush3.bf16.msra.mxu1 %v3894_v59  ;;  %v3906_v58 = vld [vmem:[#allocation5 + $0x210] sm:$0xff]  }
  0xa4   : > { %1108 = vmatprep.mubr.bf16.mxu1 %v4469_v57  ;;  %3619 = vmatprep.subr.bf16.mxu1 %v3898_v2  ;;  %v3930_v59 = vld [vmem:[#allocation7 + $0x50] sm:$0xff]  }
  0xa7   : > { %3620 = vmatpush3.bf16.msra.mxu1 %v3898_v2  ;;  %v3937_v2 = vld [vmem:[#allocation7] sm:$0xff]  }
  0xa8   : > { %3621 = vmatprep.subr.bf16.mxu1 %v3902_v7 }
  0xaa   : > { %3602 = vmatmul.mubr.bf16.vlgmr.msra.gmra.mxu0 %v4494_v13  ;;  %1109 = vmatmul.mubr.bf16.gmra.mxu1 %v4528_v40 }
  0xab   : > { %3336 = vmatpush3.bf16.msra.mxu0 %v3896_v6  ;;  %1116 = vmatprep.mubr.bf16.mxu1 %v4486_v11  ;;  %v4611_v6 = vld [vmem:[#allocation7 + $0x178] sm:$0xff]  }
  0xac   : > { %3337 = vmatprep.subr.bf16.mxu0 %v3897_v10  ;;  %3605 = vmatprep.mubr.bf16.mxu0 %v4498_v14 }
  0xad   : > { %3622 = vmatpush3.bf16.msra.mxu1 %v3902_v7 }
  0xae   : > { %3623 = vmatprep.subr.bf16.mxu1 %v3906_v58 }
  0xaf   : > { %3338 = vmatpush3.bf16.msra.mxu0 %v3899_v19 }
  0xb0   : > { %3339 = vmatprep.subr.bf16.mxu0 %v3900_v20 }
  0xb1   : > { %3624 = vmatpush3.bf16.msra.mxu1 %v3906_v58 }
  0xb2   : > { %3606 = vmatmul.mubr.bf16.gmra.mxu0 %v4517_v32  ;;  %3625 = vmatprep.subr.bf16.mxu1 %v3910_v24 }
  0xb3   : > { %1117 = vmatmul.mubr.bf16.gmra.mxu1 %v4536_v50  ;;  %3340 = vmatpush3.bf16.msra.mxu0 %v3901_v25 }
  0xb4   : > { %3341 = vmatprep.subr.bf16.mxu0 %v3903_v26  ;;  %1124 = vmatprep.mubr.bf16.mxu1 %v4489_v12 }
  0xb5   : > { %3609 = vmatprep.mubr.bf16.mxu0 %v4522_v36  ;;  %3626 = vmatpush3.bf16.msra.mxu1 %v3910_v24 }
  0xb6   : > { %3627 = vmatprep.subr.bf16.mxu1 %v3914_v30 }
  0xb7   : > { %3342 = vmatpush3.bf16.msra.mxu0 %v3904_v31 }
  0xb8   : > { %3343 = vmatprep.subr.bf16.mxu0 %v3905_v33 }
  0xb9   : > { %3628 = vmatpush3.bf16.msra.mxu1 %v3914_v30 }
  0xba   : > { %3610 = vmatmul.mubr.bf16.gmra.mxu0 %v484_v21 }
  0xbb   : > { %1125 = vmatmul.mubr.bf16.gmra.mxu1 %v4561_v1  ;;  %3344 = vmatpush3.bf16.msra.mxu0 %v3907_v34 }
  0xbc   : > { %3345 = vmatprep.subr.bf16.mxu0 %v3908_v37  ;;  %1132 = vmatprep.mubr.bf16.mxu1 %v4557_v0 }
  0xbd   : > { %1459 = vmatprep.mubr.bf16.mxu0 %v4466_v56  ;;  %v466_v56 = vor.u32 %v465_v44, %v426_v42 }
  0xbf   : > { %3346 = vmatpush3.bf16.msra.mxu0 %v3909_v38 }
  0xc0   : > { %3347 = vmatprep.subr.bf16.mxu0 %v3911_v39 }
  0xc3   : > { %1133 = vmatmul.mubr.bf16.gmra.mxu1 %v449_v28  ;;  %3348 = vmatpush3.bf16.msra.mxu0 %v3912_v41 }
  0xc4   : > { %3349 = vmatprep.subr.bf16.mxu0 %v3913_v46  ;;  %3629 = vmatprep.mubr.bf16.mxu1 %v4494_v13  ;;  %v485_v13 = vsel %vm4446_vm5, %v466_v56, 0 }
  0xc7   : > { %3350 = vmatpush3.bf16.msra.mxu0 %v3915_v47 }
  0xca   : > { %1460 = vmatmul.mubr.bf16.vlgmr.msra.gmra.mxu0 %v4509_v27  ;;  %v3916_v27 = vld [vmem:[#allocation7 + $0x78] sm:$0xff]  }
  0xcb   : > { %3630 = vmatmul.mubr.bf16.vlgmr.msra.gmra.mxu1 %v4498_v14  ;;  %1467 = vmatprep.mubr.bf16.mxu0 %v4469_v57  ;;  %v428_v57 = vrot.slane %v426_v42, 7 }
  0xcc   : > { %3633 = vmatprep.mubr.bf16.mxu1 %v4517_v32  ;;  %v3917_v32 = vld [vmem:[#allocation7 + $0x38] sm:$0xff]   ;;  %3401 = vmatprep.subr.bf16.mxu1 %v3916_v27 }
  0xcd   : > { %v431_v14 = vor.u32 %v429_v29, %v428_v57  ;;  %3402 = vmatpush3.bf16.msra.mxu1 %v3917_v32 }
  0xd2   : > { %1468 = vmatmul.mubr.bf16.gmra.mxu0 %v4528_v40  ;;  %v3918_v40 = vld [vmem:[#allocation7 + $0xb8] sm:$0xff]  }
  0xd3   : > { %3634 = vmatmul.mubr.bf16.gmra.mxu1 %v4522_v36  ;;  %1475 = vmatprep.mubr.bf16.mxu0 %v4486_v11  ;;  %v450_v11 = vsel %vm4452_vm6, 0, %v431_v14  ;;  %v3919_v36 = vld [vmem:[#allocation7 + $0x70] sm:$0xff]  }
  0xd4   : > { %3637 = vmatprep.mubr.bf16.mxu1 %v484_v21  ;;  %3403 = vmatprep.subr.bf16.mxu1 %v3919_v36 }
  0xd5   : > { %3641 = vmatprep.subr.bf16.mxu0 %v3918_v40 }
  0xd6   : > { %3642 = vmatpush3.bf16.msra.mxu0 %v3918_v40 }
  0xd7   : > { %3643 = vmatprep.subr.bf16.mxu0 %v3923_v49 }
  0xda   : > { %1476 = vmatmul.mubr.bf16.gmra.mxu0 %v4536_v50  ;;  %v3924_v50 = vld [vmem:[#allocation7 + $0x60] sm:$0xff]  }
  0xdb   : > { %1483 = vmatprep.mubr.bf16.mxu0 %v4489_v12  ;;  %3638 = vmatmul.mubr.bf16.gmra.mxu1 %v485_v13  ;;  %v3920_v12 = vld [vmem:[#allocation7 + $0x30] sm:$0xff]  }
  0xdc   : > { %3404 = vmatpush3.bf16.msra.mxu1 %v3920_v12  ;;  %3644 = vmatpush3.bf16.msra.mxu0 %v3923_v49 }
  0xdd   : > { %3405 = vmatprep.subr.bf16.mxu1 %v3921_v48  ;;  %3645 = vmatprep.subr.bf16.mxu0 %v3926_v52 }
  0xe0   : > { %3406 = vmatpush3.bf16.msra.mxu1 %v3922_v35  ;;  %3646 = vmatpush3.bf16.msra.mxu0 %v3926_v52 }
  0xe1   : > { %3407 = vmatprep.subr.bf16.mxu1 %v3924_v50  ;;  %3647 = vmatprep.subr.bf16.mxu0 %v3929_v55 }
  0xe2   : > { %1484 = vmatmul.mubr.bf16.gmra.mxu0 %v4561_v1  ;;  %v3936_v1 = vld [vmem:[#allocation7 + $0x40] sm:$0xff]  }
  0xe3   : > { %1491 = vmatprep.mubr.bf16.mxu0 %v4557_v0  ;;  %v3935_v0 = vld [vmem:[#allocation7 + $0x90] sm:$0xff]  }
  0xe4   : > { %3408 = vmatpush3.bf16.msra.mxu1 %v3925_v51  ;;  %3648 = vmatpush3.bf16.msra.mxu0 %v3929_v55 }
  0xe5   : > { %3409 = vmatprep.subr.bf16.mxu1 %v3927_v53  ;;  %3649 = vmatprep.subr.bf16.mxu0 %v3932_v61 }
  0xe8   : > { %3410 = vmatpush3.bf16.msra.mxu1 %v3928_v54  ;;  %3650 = vmatpush3.bf16.msra.mxu0 %v3932_v61 }
  0xe9   : > { %3411 = vmatprep.subr.bf16.mxu1 %v3930_v59  ;;  %3651 = vmatprep.subr.bf16.mxu0 %v3935_v0 }
  0xea   : > { %1492 = vmatmul.mubr.bf16.gmra.mxu0 %v449_v28 }
  0xeb   : > { %1499 = vmatprep.mubr.bf16.mxu0 %v4579_v23 }
  0xec   : > { %3412 = vmatpush3.bf16.msra.mxu1 %v3931_v60  ;;  %3652 = vmatpush3.bf16.msra.mxu0 %v3935_v0 }
  0xed   : > { %3413 = vmatprep.subr.bf16.mxu1 %v3933_v62  ;;  %3653 = vmatprep.subr.bf16.mxu0 %v3938_v3 }
  0xf0   : > { %3414 = vmatpush3.bf16.msra.mxu1 %v3934_v63  ;;  %3654 = vmatpush3.bf16.msra.mxu0 %v3938_v3 }
  0xf1   : > { %3415 = vmatprep.subr.bf16.mxu1 %v3936_v1  ;;  %3655 = vmatprep.subr.bf16.mxu0 %v3941_v5 }
  0xf2   : > { %1500 = vmatmul.mubr.bf16.gmra.mxu0 %v450_v11 }
  0xf4   : > { %3416 = vmatpush3.bf16.msra.mxu1 %v3937_v2  ;;  %3656 = vmatpush3.bf16.msra.mxu0 %v3941_v5 }
  0xf5   : > { %3453 = vmatprep.subr.bf16.mxu1 %v3939_v4  ;;  %3665 = vmatprep.subr.bf16.mxu0 %v4611_v6 }
 0x13a   : > { %v3219_v7 = vpop.f32.mrf.mxu0  ;;  %v3575_v8 = vpop.f32.mrf.mxu1 }
 0x13c   : > { %v3220_v9 = vpop.f32.mrf.mxu0  ;;  %v808_v15 = vpop.f32.mrf.mxu1 }
 0x13d   : > { %v3221_v10 = vadd.f32 %v3220_v9, %v3219_v7 }
 0x13e   : > { %v3222_v16 = vpop.f32.mrf.mxu0  ;;  %v3576_v18 = vpop.f32.mrf.mxu1 }
 0x13f   : > { %v4614_v17 = vadd.f32 %v3221_v10, %v808_v15  ;;  %v4643_v10 = vld [vmem:[%s5102_s2] ss:$0 sm:$0xff] }
 0x140   : > { %v3223_v19 = vpop.f32.mrf.mxu0  ;;  %v811_v20 = vpop.f32.mrf.mxu1 }
 0x141   : > { %v3224_v58 = vadd.f32 %v3223_v19, %v3222_v16 }
 0x142   : > { %v3225_v21 = vpop.f32.mrf.mxu0  ;;  %v3579_v25 = vpop.f32.mrf.mxu1 }
 0x143   : > { %v4616_v22 = vadd.f32 %v3224_v58, %v811_v20 }
 0x144   : > { %v3226_v23 = vpop.f32.mrf.mxu0  ;;  %v824_v29 = vpop.f32.mrf.mxu1 }
 0x145   : > { %v3227_v24 = vadd.f32 %v3226_v23, %v3225_v21 }
 0x146   : > { %v3228_v26 = vpop.f32.mrf.mxu0  ;;  %v3580_v33 = vpop.f32.mrf.mxu1 }
 0x147   : > { %v4618_v28 = vadd.f32 %v3575_v8, %v3227_v24 }
 0x148   : > { %v3229_v30 = vpop.f32.mrf.mxu0  ;;  %v827_v38 = vpop.f32.mrf.mxu1 }
 0x149   : > { %v3230_v31 = vadd.f32 %v3229_v30, %v3228_v26 }
 0x14a   : > { %v3231_v34 = vpop.f32.mrf.mxu0  ;;  %v3583_v42 = vpop.f32.mrf.mxu1 }
 0x14b   : > { %v4620_v37 = vadd.f32 %v3576_v18, %v3230_v31 }
 0x14c   : > { %v3232_v39 = vpop.f32.mrf.mxu0  ;;  %v840_v13 = vpop.f32.mrf.mxu1 }
 0x14d   : > { %v3233_v41 = vadd.f32 %v3232_v39, %v3231_v34 }
 0x14e   : > { %v3234_v44 = vpop.f32.mrf.mxu0  ;;  %v3584_v27 = vpop.f32.mrf.mxu1 }
 0x14f   : > { %v4622_v46 = vadd.f32 %v3233_v41, %v824_v29 }
 0x150   : > { %v3235_v47 = vpop.f32.mrf.mxu0  ;;  %v843_v48 = vpop.f32.mrf.mxu1 }
 0x151   : > { %v3236_v56 = vadd.f32 %v3235_v47, %v3234_v44 }
 0x152   : > { %v3237_v57 = vpop.f32.mrf.mxu0 }
 0x153   : > { %v4624_v14 = vadd.f32 %v3236_v56, %v827_v38 }
 0x154   : > { %v3238_v11 = vpop.f32.mrf.mxu0 }
 0x155   : > { %v3239_v32 = vadd.f32 %v3238_v11, %v3237_v57 }
 0x156   : > { %v3240_v36 = vpop.f32.mrf.mxu0 }
 0x157   : > { %v4626_v12 = vadd.f32 %v3579_v25, %v3239_v32 }
 0x158   : > { %v3241_v40 = vpop.f32.mrf.mxu0 }
 0x159   : > { %v3242_v35 = vadd.f32 %v3241_v40, %v3240_v36 }
 0x15a   : > { %v3243_v49 = vpop.f32.mrf.mxu0  ;;  %v3285_v51 = vpop.f32.mrf.mxu1 }
 0x15b   : > { %v4628_v50 = vadd.f32 %v3580_v33, %v3242_v35 }
 0x15c   : > { %v3244_v52 = vpop.f32.mrf.mxu0  ;;  %v3286_v54 = vpop.f32.mrf.mxu1 }
 0x15d   : > { %v3245_v53 = vadd.f32 %v3244_v52, %v3243_v49 }
 0x15e   : > { %v3246_v55 = vpop.f32.mrf.mxu0  ;;  %v4630_v60 = vpop.f32.mrf.mxu1 }
 0x15f   : > { %v841_v59 = vadd.f32 %v3245_v53, %v840_v13 }
 0x160   : > { %v3247_v61 = vpop.f32.mrf.mxu0  ;;  %v3289_v63 = vpop.f32.mrf.mxu1 }
 0x161   : > { %v3248_v62 = vadd.f32 %v3247_v61, %v3246_v55  ;;  %v863_v36 = vadd.f32 %v4643_v10, %v841_v59 }
 0x162   : > { %v3249_v0 = vpop.f32.mrf.mxu0  ;;  %v4634_v2 = vpop.f32.mrf.mxu1 }
 0x163   : > { %v4632_v1 = vadd.f32 %v3248_v62, %v843_v48 }
 0x164   : > { %v3250_v3 = vpop.f32.mrf.mxu0  ;;  %v4636_v5 = vpop.f32.mrf.mxu1 }
 0x165   : > { %v3251_v4 = vadd.f32 %v3250_v3, %v3249_v0  ;;  %v3287_v3 = vadd.f32 %v3286_v54, %v3285_v51 }
 0x166   : > { %v3252_v7 = vpop.f32.mrf.mxu0  ;;  %v4638_v9 = vpop.f32.mrf.mxu1 }
 0x167   : > { %v849_v8 = vadd.f32 %v3583_v42, %v3251_v4 }
 0x168   : > { %v3253_v15 = vpop.f32.mrf.mxu0  ;;  %v4646_v19 = vpop.f32.mrf.mxu1 }
 0x169   : > { %v865_v16 = vadd.f32 %v4643_v10, %v849_v8  ;;  %v3254_v18 = vadd.f32 %v3253_v15, %v3252_v7  ;;  %v4689_v15 = vstv %s3041_s30  ;;  %s4207_s30 = smov [#allocation8]  }
 0x16a   : > { %v4648_v58 = vpop.f32.mrf.mxu0  ;;  %v4650_v21 = vpop.f32.mrf.mxu1  ;;  %vm1620_vm8 = vcmp.ge.s32.totalorder %v4689_v15, 0  ;;  %vm1626_vm9 = vcmp.lt.s32.totalorder %v4689_v15, 16  ;;  %s4080_s7 = sshll.u32 %s4207_s30, 4  ;;  %s4081_s7 = int_to_ptr.vmem [resolvable:$false] %s4080_s7 }
 0x16b   : > { %v852_v20 = vadd.f32 %v3584_v27, %v3254_v18  ;;  %vm4702_vm10 = vmand %vm1620_vm8, %vm1626_vm9  ;;  %s4082_s12 = scalar_lea.vmem %s4081_s7, 1024  ;;  %p4083_p2 = scmp.lt.s32.totalorder %s5030_s21, %s4081_s7 }
 0x16c   : > { %v1175_v23 = vpop.f32.mrf.mxu0  ;;  %v4653_v25 = vpop.f32.mrf.mxu1  ;;  %vm3067_vm13 = vmpackc.low %vm4702_vm10, %vm4702_vm10  ;;  %p4084_p4 = scmp.lt.s32.totalorder %s4082_s12, %s4076_s5 }
 0x16d   : > { %v866_v24 = vadd.f32 %v4643_v10, %v852_v20  ;;  %v1176_v18 = vadd.f32 %v3287_v3, %v1175_v23 }
 0x16e   : > { %v4655_v26 = vpop.f32.mrf.mxu0  ;;  %v4657_v29 = vpop.f32.mrf.mxu1  ;;  %p4085_p13 = por %p4084_p4, %p4083_p2 }
 0x170   : > { %v1178_v30 = vpop.f32.mrf.mxu0  ;;  %v4659_v31 = vpop.f32.mrf.mxu1  ;;  %p4086_p8 = pnand %p4085_p13, %p4079_p0 }
 0x172   : > { %v4661_v33 = vpop.f32.mrf.mxu0 }
 0x173   : > { %v4663_v34 = vpop.f32.mrf.mxu1 }
 0x174   : > { %v4665_v38 = vpop.f32.mrf.mxu0 }
 0x175   : > { %v4667_v39 = vpop.f32.mrf.mxu1 }
 0x176   : > { %v4669_v41 = vpop.f32.mrf.mxu0 }
 0x177   : > { %v4671_v42 = vpop.f32.mrf.mxu1 }
 0x178   : > { %v4673_v44 = vpop.f32.mrf.mxu0 }
 0x179   : > { %v4675_v47 = vpop.f32.mrf.mxu1 }
 0x17a   : > { %v3611_v56 = vpop.f32.mrf.mxu0 }
 0x17b   : > { %v3309_v13 = vpop.f32.mrf.mxu1 }
 0x17c   : > { %v1207_v11 = vpop.f32.mrf.mxu0 }
 0x17d   : > { %v3310_v57 = vpop.f32.mrf.mxu1 }
 0x17e   : > { %v3311_v27 = vadd.f32 %v3310_v57, %v3309_v13  ;;  %v3612_v52 = vpop.f32.mrf.mxu0 }
 0x17f   : > { %v4677_v32 = vpop.f32.mrf.mxu1 }
 0x180   : > { %v1208_v40 = vadd.f32 %v3311_v27, %v1207_v11  ;;  %v4685_v62 = vpop.f32.mrf.mxu0  ;;  %v855_v11 = vadd.f32 %v4643_v10, %v4614_v17  ;;  %v3290_v27 = vadd.f32 %v3289_v63, %v4630_v60  ;;  %v3293_v17 = vadd.f32 %v4636_v5, %v4634_v2 }
 0x181   : > { %v4680_v48 = vpop.f32.mrf.mxu1  ;;  %v3296_v2 = vadd.f32 %v4646_v19, %v4638_v9  ;;  %v858_v9 = vadd.f32 %v4643_v10, %v4620_v37 }
 0x182   : > { %v4682_v35 = vadd.f32 %v1208_v40, %v863_v36  ;;  %v1222_v54 = vadd.f32 %v1176_v18, %v855_v11 }
 0x183   : > { %v3315_v49 = vpop.f32.mrf.mxu1 }
 0x185   : > { %v3316_v53 = vpop.f32.mrf.mxu1 }
 0x186   : > { %v3317_v55 = vadd.f32 %v3316_v53, %v3315_v49  ;;  %v856_v53 = vadd.f32 %v4643_v10, %v4616_v22  ;;  %v857_v22 = vadd.f32 %v4643_v10, %v4618_v28  ;;  %v3299_v28 = vadd.f32 %v4653_v25, %v4650_v21 }
 0x187   : > { %v3318_v61 = vpop.f32.mrf.mxu1 }
 0x188   : > { %v1216_v0 = vadd.f32 %v3611_v56, %v3317_v55  ;;  %v1192_v25 = vadd.f32 %v3299_v28, %v4665_v38  ;;  %v3305_v38 = vadd.f32 %v4667_v39, %v4663_v34  ;;  %v1617_v34 = vadd.s32 3, %v4689_v15 }
 0x189   : > { %v3319_v4 = vpop.f32.mrf.mxu1 }
 0x18a   : > { %v4687_v7 = vadd.f32 %v1216_v0, %v865_v16  ;;  %v3320_v8 = vadd.f32 %v3319_v4, %v3318_v61  ;;  %v3351_v59 = vpop.f32.mrf.mxu0  ;;  %v1179_v16 = vadd.f32 %v3290_v27, %v1178_v30  ;;  %v1615_v30 = vadd.s32 1, %v4689_v15 }
 0x18b   : > { %v3631_v20 = vpop.f32.mrf.mxu1  ;;  %v1184_v0 = vadd.f32 %v4648_v58, %v3293_v17  ;;  %v1187_v27 = vadd.f32 %v4655_v26, %v3296_v2  ;;  %vm1623_vm3 = vcmp.ge.s32.totalorder %v1617_v34, 0  ;;  %vm1629_vm4 = vcmp.lt.s32.totalorder %v1617_v34, 16 }
 0x18c   : > { %v1219_v13 = vadd.f32 %v3612_v52, %v3320_v8  ;;  %v3352_v57 = vpop.f32.mrf.mxu0  ;;  %v1223_v3 = vadd.f32 %v1179_v16, %v856_v53  ;;  %vm1621_vm11 = vcmp.ge.s32.totalorder %v1615_v30, 0  ;;  %vm1627_vm12 = vcmp.lt.s32.totalorder %v1615_v30, 16  ;;  %vm4806_vm8 = vmand %vm1623_vm3, %vm1629_vm4 }
 0x18d   : > { %v3353_v36 = vadd.f32 %v3352_v57, %v3351_v59  ;;  %v1542_v40 = vpop.f32.mrf.mxu1  ;;  %v1224_v58 = vadd.f32 %v1184_v0, %v857_v22  ;;  %vm4729_vm14 = vmand %vm1621_vm11, %vm1627_vm12  ;;  %v1225_v21 = vadd.f32 %v1187_v27, %v858_v9  ;;  %v3302_v30 = vadd.f32 %v4659_v31, %v4657_v29 }
 0x18e   : > { %v4694_v56 = vadd.f32 %v1219_v13, %v866_v24  ;;  %v3354_v51 = vpop.f32.mrf.mxu0  ;;  %v860_v29 = vadd.f32 %v4643_v10, %v4624_v14  ;;  %vm3070_vm1 = vmpackc.low %vm4729_vm14, %vm4729_vm14  ;;  %v1200_v14 = vadd.f32 %v4661_v33, %v3305_v38 }
 0x18f   : > { %v1543_v49 = vadd.f32 %v3353_v36, %v1542_v40  ;;  %v3632_v23 = vpop.f32.mrf.mxu1  ;;  %v1195_v2 = vadd.f32 %v3302_v30, %v4673_v44  ;;  %v3942_v44 = vld [vmem:[#allocation7 + $0x130] sm:$0xff]   ;;  %vm4834_vm11 = vmpackc.low %vm4806_vm8, %vm4806_vm8 }
 0x190   : > { %v3355_v52 = vpop.f32.mrf.mxu0 }
 0x191   : > { %v1589_v60 = vadd.f32 %v1543_v49, %v1222_v54  ;;  %v3356_v63 = vadd.f32 %v3355_v52, %v3354_v51  ;;  %v1545_v24 = vpop.f32.mrf.mxu1  ;;  %v1616_v51 = vadd.s32 2, %v4689_v15 }
 0x192   : > { %v3357_v61 = vpop.f32.mrf.mxu0 }
 0x193   : > { %v1601_v4 = vmax.f32 %v1589_v60, 0.0  ;;  %v1546_v8 = vadd.f32 %v3356_v63, %v1545_v24  ;;  %v4714_v11 = vpop.f32.mrf.mxu1  ;;  %v859_v63 = vadd.f32 %v4643_v10, %v4622_v46  ;;  %vm1622_vm15 = vcmp.ge.s32.totalorder %v1616_v51, 0 }
 0x194   : > { %v3358_v59 = vpop.f32.mrf.mxu0  ;;  %vm1628_vm0 = vcmp.lt.s32.totalorder %v1616_v51, 16  ;;  %v3943_v51 = vld [vmem:[#allocation7 + $0xf0] sm:$0xff]  }
 0x195   : > { %v1650_v5 = vsel %vm4702_vm10, %v1601_v4, 0.0  ;;  %v1590_v18 = vadd.f32 %v1546_v8, %v1223_v3  ;;  %v3359_v13 = vadd.f32 %v3358_v59, %v3357_v61  ;;  %v1558_v52 = vpop.f32.mrf.mxu1  ;;  %v1226_v59 = vadd.f32 %v1192_v25, %v859_v63  ;;  %vm4762_vm2 = vmand %vm1622_vm15, %vm1628_vm0  ;;  %v3945_v63 = vld [vmem:[#allocation7 + $0x128] sm:$0xff]  }
 0x196   : > { %v3360_v57 = vpop.f32.mrf.mxu0  ;;  %vm4791_vm7 = vmpackc.low %vm4762_vm2, %vm4762_vm2 }
 0x197   : > { %v1602_v36 = vmax.f32 %v1590_v18, 0.0  ;;  %v1551_v40 = vadd.f32 %v3631_v20, %v3359_v13 }
 0x198   : > { %v3361_v19 = vpop.f32.mrf.mxu0 }
 0x199   : > { %v1651_v54 = vsel %vm4702_vm10, %v1602_v36, 0.0  ;;  %v3068_v16 = vpack.c.bf16 %v1602_v36, %v1601_v4  ;;  %v1591_v26 = vadd.f32 %v1551_v40, %v1224_v58  ;;  %v3362_v49 = vadd.f32 %v3361_v19, %v3360_v57  ;;  %v3940_v58 = vld [vmem:[#allocation7 + $0xf8] sm:$0xff]  }
 0x19a   : > { %v1662_v20 = vpack.c.bf16 %v1651_v54, %v1650_v5  ;;  %v3363_v53 = vpop.f32.mrf.mxu0 }
 0x19b   : > { %v1603_v17 = vmax.f32 %v1591_v26, 0.0  ;;  %v1554_v60 = vadd.f32 %v3632_v23, %v3362_v49  ;;  %3069 = vmatprep.mubr.msk.bf16.mxu1 %vm3067_vm13, %v3068_v16  ;;  %v4742_v23 = vpop.f32.mrf.mxu1  ;;  %v3308_v49 = vadd.f32 %v4675_v47, %v4671_v42  ;;  %v861_v42 = vadd.f32 %v4643_v10, %v4626_v12 }
 0x19c   : > { %v1669_v24 = vshrl.u32 %v1662_v20, 16  ;;  %v1672_v55 = vshll.u32 %v1662_v20, 16  ;;  %v3364_v61 = vpop.f32.mrf.mxu0  ;;  %v1227_v20 = vadd.f32 %v1195_v2, %v860_v29  ;;  %v862_v12 = vadd.f32 %v4643_v10, %v4628_v50  ;;  %v3946_v50 = vld [vmem:[#allocation7 + $0xe8] sm:$0xff]  }
 0x19d   : > { %v1592_v0 = vadd.f32 %v1554_v60, %v1225_v21  ;;  %v3365_v3 = vadd.f32 %v3364_v61, %v3363_v53  ;;  %v1652_v4 = vsel %vm4729_vm14, %v1603_v17, 0.0  ;;  %v1561_v28 = vpop.f32.mrf.mxu1 }
 0x19e   : > { %v3366_v8 = vpop.f32.mrf.mxu0  ;;  %v1671_v22 = vrot.slane %v1669_v24, 7  ;;  %v1722_v46 = vrot.slane %v1672_v55, 1 }
 0x19f   : > { %v1604_v5 = vmax.f32 %v1592_v0, 0.0  ;;  %v1559_v18 = vadd.f32 %v3365_v3, %v1558_v52  ;;  %v1228_v0 = vadd.f32 %v1200_v14, %v861_v42  ;;  %v1203_v3 = vadd.f32 %v4669_v41, %v3308_v49 }
 0x1a0   : > { %v3367_v31 = vpop.f32.mrf.mxu0  ;;  %v1674_v13 = vor.u32 %v1672_v55, %v1671_v22  ;;  %v1723_v57 = vor.u32 %v1722_v46, %v1669_v24  ;;  %v3314_v14 = vadd.f32 %v4680_v48, %v4677_v32  ;;  %v3949_v48 = vld [vmem:[#allocation7 + $0xe0] sm:$0xff]  }
 0x1a1   : > { %v4748_v39 = vpack.c.bf16 %v1604_v5, %v1603_v17  ;;  %v1593_v27 = vadd.f32 %v1559_v18, %v1226_v59  ;;  %v3368_v36 = vadd.f32 %v3367_v31, %v3366_v8  ;;  %v1653_v40 = vsel %vm4729_vm14, %v1604_v5, 0.0  ;;  %v4774_v17 = vpop.f32.mrf.mxu1 }
 0x1a2   : > { %v3369_v9 = vpop.f32.mrf.mxu0  ;;  %v1716_v19 = vsel %vm4452_vm6, 0, %v1674_v13  ;;  %v1740_v54 = vsel %vm4446_vm5, %v1723_v57, 0  ;;  %v1663_v16 = vpack.c.bf16 %v1653_v40, %v1652_v4 }
 0x1a3   : > { %v1605_v33 = vmax.f32 %v1593_v27, 0.0  ;;  %v1562_v52 = vadd.f32 %v3368_v36, %v1561_v28  ;;  %1978 = vmatmul.mubr.bf16.vlgmr.msra.gmra.mxu1 %v1716_v19  ;;  %3657 = vmatprep.mubr.bf16.mxu0 %v1740_v54  ;;  %v1574_v59 = vpop.f32.mrf.mxu1  ;;  %v3948_v27 = vld [vmem:[#allocation7 + $0x120] sm:$0xff]  }
 0x1a4   : > { %v3370_v53 = vpop.f32.mrf.mxu0  ;;  %3072 = vmatprep.mubr.msk.bf16.mxu1 %vm3070_vm1, %v4748_v39  ;;  %3454 = vmatpush3.bf16.msra.mxu1 %v3940_v58  ;;  %v1676_v21 = vshrl.u32 %v1663_v16, 16  ;;  %v1679_v25 = vshll.u32 %v1663_v16, 16  ;;  %v1618_v58 = vadd.s32 4, %v4689_v15 }
 0x1a5   : > { %v1594_v47 = vadd.f32 %v1562_v52, %v1227_v20  ;;  %v3371_v60 = vadd.f32 %v3370_v53, %v3369_v9  ;;  %3455 = vmatprep.subr.bf16.mxu1 %v3942_v44  ;;  %v1654_v24 = vsel %vm4762_vm2, %v1605_v33, 0.0  ;;  %v1229_v44 = vadd.f32 %v1203_v3, %v862_v12  ;;  %v4819_v34 = vpop.f32.mrf.mxu1  ;;  %v3951_v52 = vld [vmem:[#allocation7 + $0x118] sm:$0xff]  }
 0x1a6   : > { %v3372_v55 = vpop.f32.mrf.mxu0  ;;  %v1678_v61 = vrot.slane %v1676_v21, 7  ;;  %v1724_v30 = vrot.slane %v1679_v25, 1  ;;  %vm1624_vm9 = vcmp.ge.s32.totalorder %v1618_v58, 0  ;;  %v1211_v53 = vadd.f32 %v3314_v14, %v4685_v62 }
 0x1a7   : > { %v1606_v4 = vmax.f32 %v1594_v47, 0.0  ;;  %v1567_v38 = vadd.f32 %v4714_v11, %v3371_v60  ;;  %v3947_v11 = vld [vmem:[#allocation7 + $0x170] sm:$0xff]   ;;  %vm1630_vm10 = vcmp.lt.s32.totalorder %v1618_v58, 16  ;;  %v1577_v47 = vpop.f32.mrf.mxu1 }
 0x1a8   : > { %v3373_v8 = vpop.f32.mrf.mxu0  ;;  %3456 = vmatpush3.bf16.msra.mxu1 %v3943_v51  ;;  %v1681_v22 = vor.u32 %v1679_v25, %v1678_v61  ;;  %v1725_v46 = vor.u32 %v1724_v30, %v1676_v21  ;;  %v864_v25 = vadd.f32 %v4643_v10, %v4632_v1  ;;  %v3952_v10 = vld [vmem:[#allocation7 + $0xd8] sm:$0xff]   ;;  %v3953_v30 = vld [vmem:[#allocation7 + $0x160] sm:$0xff]   ;;  %vm4840_vm12 = vmand %vm1624_vm9, %vm1630_vm10 }
 0x1a9   : > { %v4784_v2 = vpack.c.bf16 %v1606_v4, %v1605_v33  ;;  %v1595_v5 = vadd.f32 %v1567_v38, %v1228_v0  ;;  %v3374_v18 = vadd.f32 %v3373_v8, %v3372_v55  ;;  %3457 = vmatprep.subr.bf16.mxu1 %v3945_v63  ;;  %v1655_v29 = vsel %vm4762_vm2, %v1606_v4, 0.0  ;;  %v3954_v38 = vld [vmem:[#allocation7 + $0x110] sm:$0xff]   ;;  %vm3112_vm14 = vmpackc.low %vm4840_vm12, %vm4840_vm12 }
 0x1aa   : > { %v3375_v31 = vpop.f32.mrf.mxu0  ;;  %v4797_v13 = vsel %vm4452_vm6, 0, %v1681_v22  ;;  %v4801_v57 = vsel %vm4446_vm5, %v1725_v46, 0  ;;  %v1664_v36 = vpack.c.bf16 %v1655_v29, %v1654_v24  ;;  %v1231_v8 = vadd.f32 %v1211_v53, %v864_v25  ;;  %v3955_v58 = vld [vmem:[#allocation7 + $0xd0] sm:$0xff]   ;;  %v3962_v25 = vld [vmem:[#allocation7 + $0x148] sm:$0xff]  }
 0x1ab   : > { %v1607_v28 = vmax.f32 %v1595_v5, 0.0  ;;  %v1570_v9 = vadd.f32 %v4742_v23, %v3374_v18  ;;  %1986 = vmatmul.mubr.bf16.gmra.mxu1 %v4797_v13  ;;  %3658 = vmatmul.mubr.bf16.vlgmr.msra.gmra.mxu0 %v4801_v57  ;;  %v3950_v23 = vld [vmem:[#allocation7 + $0x168] sm:$0xff]  }
 0x1ac   : > { %3666 = vmatpush3.bf16.msra.mxu0 %v4611_v6  ;;  %v3376_v19 = vpop.f32.mrf.mxu0  ;;  %3075 = vmatprep.mubr.msk.bf16.mxu1 %vm4791_vm7, %v4784_v2  ;;  %v1683_v54 = vshrl.u32 %v1664_v36, 16  ;;  %v1686_v16 = vshll.u32 %v1664_v36, 16 }
 0x1ad   : > { %v1596_v26 = vadd.f32 %v1570_v9, %v1229_v44  ;;  %v3377_v32 = vadd.f32 %v3376_v19, %v3375_v31  ;;  %3458 = vmatpush3.bf16.msra.mxu1 %v3946_v50  ;;  %3667 = vmatprep.subr.bf16.mxu0 %v3947_v11  ;;  %v1656_v49 = vsel %vm4806_vm8, %v1607_v28, 0.0  ;;  %v3957_v44 = vld [vmem:[#allocation7 + $0x108] sm:$0xff]  }
 0x1ae   : > { %v3378_v20 = vpop.f32.mrf.mxu0  ;;  %3459 = vmatprep.subr.bf16.mxu1 %v3948_v27  ;;  %v1685_v6 = vrot.slane %v1683_v54, 7  ;;  %v1726_v33 = vrot.slane %v1686_v16, 1  ;;  %v3956_v27 = vld [vmem:[#allocation7 + $0x158] sm:$0xff]  }
 0x1af   : > { %v1608_v51 = vmax.f32 %v1596_v26, 0.0  ;;  %v1575_v21 = vadd.f32 %v3377_v32, %v1574_v59  ;;  %v1619_v59 = vadd.s32 5, %v4689_v15 }
 0x1b0   : > { %3668 = vmatpush3.bf16.msra.mxu0 %v3947_v11  ;;  %v3379_v42 = vpop.f32.mrf.mxu0  ;;  %v1688_v60 = vor.u32 %v1686_v16, %v1685_v6  ;;  %v1727_v63 = vor.u32 %v1726_v33, %v1683_v54  ;;  %v3960_v33 = vld [vmem:[#allocation7 + $0x100] sm:$0xff]  }
 0x1b1   : > { %v4826_v24 = vpack.c.bf16 %v1608_v51, %v1607_v28  ;;  %v1597_v55 = vadd.f32 %v1575_v21, %v4682_v35  ;;  %v3380_v61 = vadd.f32 %v3379_v42, %v3378_v20  ;;  %3460 = vmatpush3.bf16.msra.mxu1 %v3949_v48  ;;  %3669 = vmatprep.subr.bf16.mxu0 %v3950_v23  ;;  %v1657_v62 = vsel %vm4806_vm8, %v1608_v51, 0.0  ;;  %v3963_v42 = vld [vmem:[#allocation7 + $0x1f8] sm:$0xff]  }
 0x1b2   : > { %v3381_v35 = vpop.f32.mrf.mxu0  ;;  %v4846_v3 = vsel %vm4452_vm6, 0, %v1688_v60  ;;  %v4850_v4 = vsel %vm4446_vm5, %v1727_v63, 0  ;;  %3461 = vmatprep.subr.bf16.mxu1 %v3951_v52  ;;  %v1665_v12 = vpack.c.bf16 %v1657_v62, %v1656_v49  ;;  %vm1625_vm13 = vcmp.ge.s32.totalorder %v1619_v59, 0  ;;  %v3966_v63 = vld [vmem:[#allocation7 + $0x1f0] sm:$0xff]   ;;  %v3969_v62 = vld [vmem:[#allocation7 + $0x1e8] sm:$0xff]  }
 0x1b3   : > { %v1609_v22 = vmax.f32 %v1597_v55, 0.0  ;;  %v1578_v46 = vadd.f32 %v3380_v61, %v1577_v47  ;;  %1994 = vmatmul.mubr.bf16.gmra.mxu1 %v4846_v3  ;;  %3661 = vmatprep.mubr.bf16.mxu0 %v4850_v4  ;;  %vm1631_vm15 = vcmp.lt.s32.totalorder %v1619_v59, 16  ;;  %v3968_v61 = vld [vmem:[#allocation7 + $0x238] sm:$0xff]  }
 0x1b4   : > { %3670 = vmatpush3.bf16.msra.mxu0 %v3950_v23  ;;  %v3382_v5 = vpop.f32.mrf.mxu0  ;;  %3078 = vmatprep.mubr.msk.bf16.mxu1 %vm4834_vm11, %v4826_v24  ;;  %v1690_v18 = vshrl.u32 %v1665_v12, 16  ;;  %v1693_v29 = vshll.u32 %v1665_v12, 16  ;;  %v3958_v23 = vld [vmem:[#allocation7 + $0xc8] sm:$0xff]   ;;  %vm4868_vm0 = vmand %vm1625_vm13, %vm1631_vm15  ;;  %v3975_v59 = vld [vmem:[#allocation7 + $0x1d8] sm:$0xff]  }
 0x1b5   : > { %v1658_v50 = vsel %vm4840_vm12, %v1609_v22, 0.0  ;;  %v1598_v11 = vadd.f32 %v1578_v46, %v1231_v8  ;;  %v3383_v31 = vadd.f32 %v3382_v5, %v3381_v35  ;;  %3462 = vmatpush3.bf16.msra.mxu1 %v3952_v10  ;;  %3671 = vmatprep.subr.bf16.mxu0 %v3953_v30  ;;  %v3971_v35 = vld [vmem:[#allocation7 + $0x230] sm:$0xff]   ;;  %v3973_v8 = vld [vmem:[#allocation7 + $0x1a0] sm:$0xff]   ;;  %v3974_v46 = vld [vmem:[#allocation7 + $0x228] sm:$0xff]  }
 0x1b6   : > { %v3384_v36 = vpop.f32.mrf.mxu0  ;;  %3463 = vmatprep.subr.bf16.mxu1 %v3954_v38  ;;  %v1692_v15 = vrot.slane %v1690_v18, 7  ;;  %v1728_v40 = vrot.slane %v1693_v29, 1  ;;  %v3972_v38 = vld [vmem:[#allocation7 + $0x1e0] sm:$0xff]  }
 0x1b7   : > { %v1610_v14 = vmax.f32 %v1598_v11, 0.0  ;;  %v1583_v28 = vadd.f32 %v4774_v17, %v3383_v31  ;;  %v3979_v31 = vld [vmem:[#allocation7 + $0x190] sm:$0xff]  }
 0x1b8   : > { %3672 = vmatpush3.bf16.msra.mxu0 %v3953_v30  ;;  %v3385_v9 = vpop.f32.mrf.mxu0  ;;  %v1695_v19 = vor.u32 %v1693_v29, %v1692_v15  ;;  %v1729_v54 = vor.u32 %v1728_v40, %v1690_v18  ;;  %v3970_v30 = vld [vmem:[#allocation7 + $0x1a8] sm:$0xff]   ;;  %v3976_v18 = vld [vmem:[#allocation7 + $0x198] sm:$0xff]   ;;  %v3977_v29 = vld [vmem:[#allocation7 + $0x220] sm:$0xff]  }
 0x1b9   : > { %v1659_v16 = vsel %vm4840_vm12, %v1610_v14, 0.0  ;;  %v4863_v26 = vpack.c.bf16 %v1610_v14, %v1609_v22  ;;  %v1599_v32 = vadd.f32 %v1583_v28, %v4687_v7  ;;  %v3386_v48 = vadd.f32 %v3385_v9, %v3384_v36  ;;  %3464 = vmatpush3.bf16.msra.mxu1 %v3955_v58  ;;  %3673 = vmatprep.subr.bf16.mxu0 %v3956_v27  ;;  %v3959_v7 = vld [vmem:[#allocation7 + $0x150] sm:$0xff]   ;;  %v3980_v58 = vld [vmem:[#allocation7 + $0x218] sm:$0xff]   ;;  %v3981_v36 = vld [vmem:[#allocation7 + $0x1c8] sm:$0xff]  }
 0x1ba   : > { %v4866_v49 = vpack.c.bf16 %v1659_v16, %v1658_v50  ;;  %v4874_v20 = vsel %vm4452_vm6, 0, %v1695_v19  ;;  %v4878_v6 = vsel %vm4446_vm5, %v1729_v54, 0  ;;  %3465 = vmatprep.subr.bf16.mxu1 %v3957_v44  ;;  %v3978_v50 = vld [vmem:[#allocation7 + $0x1d0] sm:$0xff]   ;;  %v3982_v15 = vld [vmem:[#allocation7 + $0x188] sm:$0xff]   ;;  %v3984_v44 = vld [vmem:[#allocation7 + $0x1c0] sm:$0xff]  }
 0x1bb   : > { %v1611_v52 = vmax.f32 %v1599_v32, 0.0  ;;  %v1586_v53 = vadd.f32 %v4819_v34, %v3386_v48  ;;  %2002 = vmatmul.mubr.bf16.gmra.mxu1 %v4874_v20  ;;  %3662 = vmatmul.mubr.bf16.gmra.mxu0 %v4878_v6  ;;  %v3961_v34 = vld [vmem:[#allocation7 + $0xc0] sm:$0xff]   ;;  %v3986_v28 = vld [vmem:[#allocation7 + $0x208] sm:$0xff]  }
 0x1bc   : > { %3674 = vmatpush3.bf16.msra.mxu0 %v3956_v27  ;;  %3105 = vmatprep.mubr.msk.bf16.mxu1 %vm3070_vm1, %v4748_v39  ;;  %v3964_v39 = vld [vmem:[#allocation7 + $0x1b8] sm:$0xff]   ;;  %v1700_v10 = vshll.u32 %v4866_v49, 16  ;;  %v1697_v12 = vshrl.u32 %v4866_v49, 16  ;;  %v3985_v14 = vld [vmem:[#allocation7 + $0x180] sm:$0xff]   ;;  %vm3148_vm1 = vmpackc.low %vm4868_vm0, %vm4868_vm0 }
 0x1bd   : > { %v1660_v51 = vsel %vm4868_vm0, %v1611_v52, 0.0  ;;  %v1600_v21 = vadd.f32 %v1586_v53, %v4694_v56  ;;  %3466 = vmatpush3.bf16.msra.mxu1 %v3958_v23  ;;  %3681 = vmatprep.mubr.bf16.mxu0 %v4801_v57  ;;  %v3965_v56 = vld [vmem:[#allocation7 + $0x140] sm:$0xff]   ;;  %v3967_v57 = vld [vmem:[#allocation7 + $0x1b0] sm:$0xff]  }
 0x1be   : > { %3675 = vmatprep.subr.bf16.mxu0 %v3959_v7  ;;  %3467 = vmatprep.subr.bf16.mxu1 %v3960_v33  ;;  %v1699_v11 = vrot.slane %v1697_v12, 7  ;;  %v3987_v9 = vld [vmem:[#allocation7 + $0x200] sm:$0xff]  }
 0x1bf   : > { %v1612_v47 = vmax.f32 %v1600_v21, 0.0 }
 0x1c0   : > { %3676 = vmatpush3.bf16.msra.mxu0 %v3959_v7  ;;  %v1702_v27 = vor.u32 %v1700_v10, %v1699_v11 }
 0x1c1   : > { %v1661_v37 = vsel %vm4868_vm0, %v1612_v47, 0.0  ;;  %v4895_v60 = vpack.c.bf16 %v1612_v47, %v1611_v52  ;;  %3468 = vmatpush3.bf16.msra.mxu1 %v3961_v34  ;;  %3677 = vmatprep.subr.bf16.mxu0 %v3962_v25 }
 0x1c2   : > { %3505 = vmatprep.subr.bf16.mxu1 %v3963_v42  ;;  %v4897_v55 = vpack.c.bf16 %v1661_v37, %v1660_v51  ;;  %v1720_v40 = vsel %vm4452_vm6, 0, %v1702_v27 }
 0x1c4   : > { %2309 = vmatmul.mubr.bf16.vlgmr.msra.gmra.mxu1 %v4797_v13  ;;  %3678 = vmatpush3.bf16.msra.mxu0 %v3962_v25  ;;  %v1730_v13 = vrot.slane %v1700_v10, 1  ;;  %v1707_v41 = vshll.u32 %v4897_v55, 16  ;;  %v1704_v19 = vshrl.u32 %v4897_v55, 16 }
 0x1c5   : > { %3108 = vmatprep.mubr.msk.bf16.mxu1 %vm4791_vm7, %v4784_v2  ;;  %3506 = vmatpush3.bf16.msra.mxu1 %v3964_v39 }
 0x1c6   : > { %3679 = vmatprep.subr.bf16.mxu0 %v3965_v56  ;;  %3507 = vmatprep.subr.bf16.mxu1 %v3966_v63  ;;  %v1731_v22 = vor.u32 %v1730_v13, %v1697_v12 }
 0x1c8   : > { %3680 = vmatpush3.bf16.msra.mxu0 %v3965_v56  ;;  %v1744_v5 = vsel %vm4446_vm5, %v1731_v22, 0 }
 0x1c9   : > { %3508 = vmatpush3.bf16.msra.mxu1 %v3967_v57  ;;  %3689 = vmatprep.subr.bf16.mxu0 %v3968_v61 }
 0x1ca   : > { %3509 = vmatprep.subr.bf16.mxu1 %v3969_v62 }
 0x1cb   : > { %3682 = vmatmul.mubr.bf16.vlgmr.msra.gmra.mxu0 %v4850_v4 }
 0x1cc   : > { %2317 = vmatmul.mubr.bf16.gmra.mxu1 %v4846_v3  ;;  %3685 = vmatprep.mubr.bf16.mxu0 %v4878_v6 }
 0x1cd   : > { %3690 = vmatpush3.bf16.msra.mxu0 %v3968_v61  ;;  %3111 = vmatprep.mubr.msk.bf16.mxu1 %vm4834_vm11, %v4826_v24 }
 0x1ce   : > { %3510 = vmatpush3.bf16.msra.mxu1 %v3970_v30  ;;  %3691 = vmatprep.subr.bf16.mxu0 %v3971_v35 }
 0x1cf   : > { %3511 = vmatprep.subr.bf16.mxu1 %v3972_v38 }
 0x1d1   : > { %3692 = vmatpush3.bf16.msra.mxu0 %v3971_v35 }
 0x1d2   : > { %3512 = vmatpush3.bf16.msra.mxu1 %v3973_v8  ;;  %3693 = vmatprep.subr.bf16.mxu0 %v3974_v46 }
 0x1d3   : > { %3686 = vmatmul.mubr.bf16.gmra.mxu0 %v1744_v5  ;;  %3513 = vmatprep.subr.bf16.mxu1 %v3975_v59 }
 0x1d4   : > { %2325 = vmatmul.mubr.bf16.gmra.mxu1 %v4874_v20  ;;  %3705 = vmatprep.mubr.bf16.mxu0 %v4850_v4  ;;  %v3983_v4 = vld [vmem:[#allocation7 + $0x210] sm:$0xff]  }
 0x1d5   : > { %3694 = vmatpush3.bf16.msra.mxu0 %v3974_v46  ;;  %3114 = vmatprep.mubr.msk.bf16.mxu1 %vm3112_vm14, %v4863_v26 }
 0x1d6   : > { %3514 = vmatpush3.bf16.msra.mxu1 %v3976_v18  ;;  %3695 = vmatprep.subr.bf16.mxu0 %v3977_v29 }
 0x1d7   : > { %3515 = vmatprep.subr.bf16.mxu1 %v3978_v50 }
 0x1d9   : > { %3696 = vmatpush3.bf16.msra.mxu0 %v3977_v29 }
 0x1da   : > { %3516 = vmatpush3.bf16.msra.mxu1 %v3979_v31  ;;  %3697 = vmatprep.subr.bf16.mxu0 %v3980_v58 }
 0x1db   : > { %3517 = vmatprep.subr.bf16.mxu1 %v3981_v36 }
 0x1dc   : > { %2333 = vmatmul.mubr.bf16.gmra.mxu1 %v1720_v40 }
 0x1dd   : > { %3698 = vmatpush3.bf16.msra.mxu0 %v3980_v58  ;;  %3141 = vmatprep.mubr.msk.bf16.mxu1 %vm4791_vm7, %v4784_v2  ;;  %v1732_v2 = vrot.slane %v1707_v41, 1 }
 0x1de   : > { %3518 = vmatpush3.bf16.msra.mxu1 %v3982_v15  ;;  %3699 = vmatprep.subr.bf16.mxu0 %v3983_v4 }
 0x1df   : > { %3519 = vmatprep.subr.bf16.mxu1 %v3984_v44 }
 0x1e1   : > { %3700 = vmatpush3.bf16.msra.mxu0 %v3983_v4 }
 0x1e2   : > { %3520 = vmatpush3.bf16.msra.mxu1 %v3985_v14  ;;  %3701 = vmatprep.subr.bf16.mxu0 %v3986_v28 }
 0x1e5   : > { %2640 = vmatmul.mubr.bf16.vlgmr.msra.gmra.mxu1 %v4846_v3  ;;  %3702 = vmatpush3.bf16.msra.mxu0 %v3986_v28  ;;  %v1706_v3 = vrot.slane %v1704_v19, 7 }
 0x1e6   : > { %3144 = vmatprep.mubr.msk.bf16.mxu1 %vm4834_vm11, %v4826_v24  ;;  %3703 = vmatprep.subr.bf16.mxu0 %v3987_v9  ;;  %v1733_v24 = vor.u32 %v1732_v2, %v1704_v19  ;;  %v4986_v2 = vld [vmem:[%s5104_s4] ss:$0 sm:$0xff] }
 0x1e7   : > { %v1709_v54 = vor.u32 %v1707_v41, %v1706_v3 }
 0x1e8   : > { %v1745_v1 = vsel %vm4446_vm5, %v1733_v24, 0 }
 0x1e9   : > { %3704 = vmatpush3.bf16.msra.mxu0 %v3987_v9  ;;  %v1721_v16 = vsel %vm4452_vm6, 0, %v1709_v54 }
 0x1ec   : > { %3706 = vmatmul.mubr.bf16.vlgmr.msra.gmra.mxu0 %v4878_v6 }
 0x1ed   : > { %2648 = vmatmul.mubr.bf16.gmra.mxu1 %v4874_v20  ;;  %3709 = vmatprep.mubr.bf16.mxu0 %v1744_v5 }
 0x1ee   : > { %3147 = vmatprep.mubr.msk.bf16.mxu1 %vm3112_vm14, %v4863_v26 }
 0x1f4   : > { %3710 = vmatmul.mubr.bf16.gmra.mxu0 %v1745_v1 }
 0x1f5   : > { %2656 = vmatmul.mubr.bf16.gmra.mxu1 %v1720_v40 }
 0x1f6   : > { %3150 = vmatprep.mubr.msk.bf16.mxu1 %vm3148_vm1, %v4895_v60 }
 0x1fd   : > { %2664 = vmatmul.mubr.bf16.gmra.mxu1 %v1721_v16 }
 0x263   : > { %v3417_v0 = vpop.f32.mrf.mxu1 }
 0x265   : > { %v3418_v26 = vpop.f32.mrf.mxu1 }
 0x266   : > { %v3419_v32 = vadd.f32 %v3418_v26, %v3417_v0 }
 0x267   : > { %v3420_v48 = vpop.f32.mrf.mxu1 }
 0x269   : > { %v3421_v43 = vpop.f32.mrf.mxu1 }
 0x26a   : > { %v3422_v23 = vadd.f32 %v3421_v43, %v3420_v48 }
 0x26b   : > { %v3423_v49 = vpop.f32.mrf.mxu1  ;;  %v3659_v33 = vpop.f32.mrf.mxu0 }
 0x26d   : > { %v3424_v17 = vpop.f32.mrf.mxu1  ;;  %v2044_v51 = vpop.f32.mrf.mxu0 }
 0x26e   : > { %v3425_v20 = vadd.f32 %v3424_v17, %v3423_v49  ;;  %v2045_v28 = vadd.f32 %v3419_v32, %v2044_v51 }
 0x26f   : > { %v3426_v6 = vpop.f32.mrf.mxu1  ;;  %v3660_v25 = vpop.f32.mrf.mxu0 }
 0x270   : > { %v2053_v54 = vadd.f32 %v3659_v33, %v3425_v20  ;;  %v2075_v26 = vadd.f32 %v4986_v2, %v2045_v28 }
 0x271   : > { %v3427_v7 = vpop.f32.mrf.mxu1  ;;  %v2047_v37 = vpop.f32.mrf.mxu0 }
 0x272   : > { %v3428_v16 = vadd.f32 %v3427_v7, %v3426_v6  ;;  %v2048_v48 = vadd.f32 %v3422_v23, %v2047_v37 }
 0x273   : > { %v3429_v52 = vpop.f32.mrf.mxu1 }
 0x274   : > { %v2076_v7 = vadd.f32 %v4986_v2, %v2048_v48 }
 0x275   : > { %v3430_v53 = vpop.f32.mrf.mxu1 }
 0x276   : > { %v4951_v21 = vadd.f32 %v3430_v53, %v3429_v52 }
 0x277   : > { %v4953_v45 = vpop.f32.mrf.mxu1 }
 0x279   : > { %v4955_v34 = vpop.f32.mrf.mxu1 }
 0x27b   : > { %v3435_v42 = vpop.f32.mrf.mxu1  ;;  %v4961_v56 = vpop.f32.mrf.mxu0 }
 0x27d   : > { %v3436_v47 = vpop.f32.mrf.mxu1  ;;  %v4965_v55 = vpop.f32.mrf.mxu0 }
 0x27e   : > { %v4957_v60 = vadd.f32 %v3436_v47, %v3435_v42 }
 0x27f   : > { %v4959_v39 = vpop.f32.mrf.mxu1  ;;  %v4967_v62 = vpop.f32.mrf.mxu0 }
 0x281   : > { %v4963_v63 = vpop.f32.mrf.mxu1  ;;  %v4969_v35 = vpop.f32.mrf.mxu0 }
 0x284   : > { %v3469_v57 = vpop.f32.mrf.mxu1 }
 0x286   : > { %v3470_v61 = vpop.f32.mrf.mxu1 }
 0x287   : > { %v3471_v9 = vadd.f32 %v3470_v61, %v3469_v57  ;;  %v2077_v61 = vadd.f32 %v4986_v2, %v2053_v54 }
 0x288   : > { %v3472_v10 = vpop.f32.mrf.mxu1 }
 0x28a   : > { %v3473_v30 = vpop.f32.mrf.mxu1 }
 0x28b   : > { %v3683_v38 = vpop.f32.mrf.mxu0  ;;  %v3474_v43 = vadd.f32 %v3473_v30, %v3472_v10 }
 0x28c   : > { %v3475_v13 = vpop.f32.mrf.mxu1 }
 0x28d   : > { %v2375_v22 = vpop.f32.mrf.mxu0 }
 0x28e   : > { %v3476_v12 = vpop.f32.mrf.mxu1  ;;  %v2376_v1 = vadd.f32 %v3471_v9, %v2375_v22  ;;  %v2061_v9 = vadd.f32 %v4951_v21, %v4965_v55 }
 0x28f   : > { %v3684_v5 = vpop.f32.mrf.mxu0  ;;  %v3477_v19 = vadd.f32 %v3476_v12, %v3475_v13  ;;  %v2056_v13 = vadd.f32 %v3660_v25, %v3428_v16 }
 0x290   : > { %v3478_v8 = vpop.f32.mrf.mxu1  ;;  %v2406_v51 = vadd.f32 %v2376_v1, %v2075_v26 }
 0x291   : > { %v2378_v50 = vpop.f32.mrf.mxu0  ;;  %v2384_v17 = vadd.f32 %v3683_v38, %v3477_v19  ;;  %v2078_v25 = vadd.f32 %v4986_v2, %v2056_v13  ;;  %v2069_v13 = vadd.f32 %v4961_v56, %v4957_v60 }
 0x292   : > { %v3479_v46 = vpop.f32.mrf.mxu1  ;;  %v2379_v42 = vadd.f32 %v3474_v43, %v2378_v50 }
 0x293   : > { %v4973_v58 = vpop.f32.mrf.mxu0  ;;  %v3480_v52 = vadd.f32 %v3479_v46, %v3478_v8  ;;  %v2408_v10 = vadd.f32 %v2384_v17, %v2077_v61  ;;  %v3992_v46 = vld [vmem:[%s4459_s17] sm:$0xff]  }
 0x294   : > { %v3481_v59 = vpop.f32.mrf.mxu1  ;;  %v2407_v22 = vadd.f32 %v2379_v42, %v2076_v7  ;;  %v2753_v50 = vunpack.c.l.bf16 %v3992_v46 }
 0x295   : > { %v2391_v15 = vpop.f32.mrf.mxu0  ;;  %v2387_v30 = vadd.f32 %v3684_v5, %v3480_v52  ;;  %v2079_v52 = vadd.f32 %v4986_v2, %v2061_v9 }
 0x296   : > { %v3482_v18 = vpop.f32.mrf.mxu1 }
 0x297   : > { %v4981_v44 = vpop.f32.mrf.mxu0  ;;  %v3483_v38 = vadd.f32 %v3482_v18, %v3481_v59  ;;  %v3434_v59 = vadd.f32 %v4955_v34, %v4953_v45  ;;  %v2409_v16 = vadd.f32 %v2387_v30, %v2078_v25 }
 0x298   : > { %v3484_v29 = vpop.f32.mrf.mxu1 }
 0x299   : > { %v4988_v24 = vpop.f32.mrf.mxu0  ;;  %v2064_v43 = vadd.f32 %v3434_v59, %v4969_v35 }
 0x29a   : > { %v3485_v11 = vpop.f32.mrf.mxu1 }
 0x29b   : > { %v3486_v18 = vadd.f32 %v3485_v11, %v3484_v29 }
 0x29c   : > { %v4971_v31 = vpop.f32.mrf.mxu1 }
 0x29d   : > { %v2395_v11 = vadd.f32 %v3486_v18, %v4988_v24 }
 0x29e   : > { %v4975_v27 = vpop.f32.mrf.mxu1 }
 0x29f   : > { %v3489_v35 = vadd.f32 %v4975_v27, %v4971_v31 }
 0x2a0   : > { %v4977_v36 = vpop.f32.mrf.mxu1 }
 0x2a1   : > { %v2400_v56 = vadd.f32 %v4973_v58, %v3489_v35 }
 0x2a2   : > { %v4979_v4 = vpop.f32.mrf.mxu1 }
 0x2a5   : > { %v3521_v40 = vpop.f32.mrf.mxu1 }
 0x2a7   : > { %v3522_v14 = vpop.f32.mrf.mxu1 }
 0x2a8   : > { %v3523_v32 = vadd.f32 %v3522_v14, %v3521_v40  ;;  %v2754_v14 = vunpack.c.h.bf16 %v3992_v46 }
 0x2a9   : > { %v3524_v41 = vpop.f32.mrf.mxu1 }
 0x2ab   : > { %v3525_v3 = vpop.f32.mrf.mxu1 }
 0x2ac   : > { %v3707_v0 = vpop.f32.mrf.mxu0  ;;  %v3526_v33 = vadd.f32 %v3525_v3, %v3524_v41 }
 0x2ad   : > { %v3527_v49 = vpop.f32.mrf.mxu1 }
 0x2ae   : > { %v2706_v53 = vpop.f32.mrf.mxu0 }
 0x2af   : > { %v2707_v47 = vadd.f32 %v3523_v32, %v2706_v53  ;;  %v3528_v57 = vpop.f32.mrf.mxu1  ;;  %v3993_v32 = vld [vmem:[%s4459_s17 + $0x8] sm:$0xff]  }
 0x2b0   : > { %v3529_v20 = vadd.f32 %v3528_v57, %v3527_v49  ;;  %v3708_v6 = vpop.f32.mrf.mxu0  ;;  %v2755_v21 = vunpack.c.l.bf16 %v3993_v32  ;;  %v2756_v49 = vunpack.c.h.bf16 %v3993_v32 }
 0x2b1   : > { %v2737_v23 = vadd.f32 %v2707_v47, %v2406_v51  ;;  %v3530_v37 = vpop.f32.mrf.mxu1 }
 0x2b2   : > { %v2715_v12 = vadd.f32 %v3707_v0, %v3529_v20  ;;  %v2709_v8 = vpop.f32.mrf.mxu0  ;;  %v2392_v0 = vadd.f32 %v3483_v38, %v2391_v15  ;;  %v3440_v20 = vadd.f32 %v4963_v63, %v4959_v39  ;;  %v3492_v39 = vadd.f32 %v4979_v4, %v4977_v36 }
 0x2b3   : > { %v2710_v40 = vadd.f32 %v3526_v33, %v2709_v8  ;;  %v3531_v28 = vpop.f32.mrf.mxu1  ;;  %v2745_v1 = vmax.f32 %v2737_v23, 0.0 }
 0x2b4   : > { %v2739_v41 = vadd.f32 %v2715_v12, %v2408_v10  ;;  %v3532_v19 = vadd.f32 %v3531_v28, %v3530_v37  ;;  %v3711_v5 = vpop.f32.mrf.mxu0  ;;  %v2410_v47 = vadd.f32 %v2392_v0, %v2079_v52  ;;  %v2072_v38 = vadd.f32 %v4967_v62, %v3440_v20  ;;  %v3994_v12 = vld [vmem:[%s4459_s17 + $0x10] sm:$0xff]   ;;  %v3995_v0 = vld [vmem:[%s4459_s17 + $0x18] sm:$0xff]   ;;  %s5040_s17 = scalar_lea.sflag [#allocation4], %s283_s16 }
 0x2b5   : > { %v2738_v3 = vadd.f32 %v2710_v40, %v2407_v22  ;;  %v3533_v54 = vpop.f32.mrf.mxu1  ;;  %v2761_v53 = vadd.f32 %v2753_v50, %v2745_v1  ;;  %v2757_v8 = vunpack.c.l.bf16 %v3994_v12  ;;  %v2758_v22 = vunpack.c.h.bf16 %v3994_v12 }
 0x2b6   : > { %v2718_v26 = vadd.f32 %v3708_v6, %v3532_v19  ;;  %v2722_v48 = vpop.f32.mrf.mxu0  ;;  %v2747_v45 = vmax.f32 %v2739_v41, 0.0  ;;  %v2080_v6 = vadd.f32 %v4986_v2, %v2064_v43  ;;  %v2081_v50 = vadd.f32 %v4986_v2, %v2069_v13 }
 0x2b7   : > { %v2746_v55 = vmax.f32 %v2738_v3, 0.0  ;;  %v3534_v17 = vpop.f32.mrf.mxu1  ;;  %v2403_v36 = vadd.f32 %v4981_v44, %v3492_v39  ;;  %v2082_v9 = vadd.f32 %v4986_v2, %v2072_v38 }
 0x2b8   : > { %v2740_v34 = vadd.f32 %v2718_v26, %v2409_v16  ;;  %v3535_v29 = vadd.f32 %v3534_v17, %v3533_v54  ;;  %v3712_v51 = vpop.f32.mrf.mxu0  ;;  %v2763_v33 = vadd.f32 %v2755_v21, %v2747_v45  ;;  %v2411_v30 = vadd.f32 %v2395_v11, %v2080_v6 }
 0x2b9   : > { %v2762_v15 = vadd.f32 %v2754_v14, %v2746_v55  ;;  %v3536_v42 = vpop.f32.mrf.mxu1  ;;  %v2412_v25 = vadd.f32 %v2400_v56, %v2081_v50  ;;  %v2413_v3 = vadd.f32 %v2403_v36, %v2082_v9  ;;  %v2760_v26 = vunpack.c.h.bf16 %v3995_v0 }
 0x2ba   : > { %v2748_v57 = vmax.f32 %v2740_v34, 0.0  ;;  %v2723_v61 = vadd.f32 %v3535_v29, %v2722_v48  ;;  %v2725_v31 = vpop.f32.mrf.mxu0 }
 0x2bb   : > { %v3183_v7 = vpack.c.bf16 %v2762_v15, %v2761_v53  ;;  %v3537_v24 = vpop.f32.mrf.mxu1 }
 0x2bc   : > { %v2764_v23 = vadd.f32 %v2756_v49, %v2748_v57  ;;  %v2741_v37 = vadd.f32 %v2723_v61, %v2410_v47  ;;  %v3538_v10 = vadd.f32 %v3537_v24, %v3536_v42 }
 0x2bd   : > { %3184 = vst [vmem:[%s5013_s25] sm:$0xff] %v3183_v7   ;;  %v3539_v60 = vpop.f32.mrf.mxu1 }
 0x2be   : > { %v3188_v63 = vpack.c.bf16 %v2764_v23, %v2763_v33  ;;  %v2726_v27 = vadd.f32 %v3538_v10, %v2725_v31  ;;  %v2749_v40 = vmax.f32 %v2741_v37, 0.0 }
 0x2bf   : > { %v3540_v46 = vpop.f32.mrf.mxu1 }
 0x2c0   : > { %3200 = vst [vmem:[%s5013_s25 + $0x8] sm:$0xff] %v3188_v63   ;;  %v2742_v14 = vadd.f32 %v2726_v27, %v2411_v30  ;;  %v3541_v28 = vadd.f32 %v3540_v46, %v3539_v60  ;;  %v2765_v19 = vadd.f32 %v2757_v8, %v2749_v40 }
 0x2c1   : > { %v3542_v58 = vpop.f32.mrf.mxu1 }
 0x2c2   : > { %v2750_v4 = vmax.f32 %v2742_v14, 0.0  ;;  %v2731_v62 = vadd.f32 %v3711_v5, %v3541_v28  ;;  %v2759_v5 = vunpack.c.l.bf16 %v3995_v0 }
 0x2c3   : > { %v3543_v41 = vpop.f32.mrf.mxu1 }
 0x2c4   : > { %v2766_v59 = vadd.f32 %v2758_v22, %v2750_v4  ;;  %v2743_v18 = vadd.f32 %v2731_v62, %v2412_v25  ;;  %v3544_v1 = vadd.f32 %v3543_v41, %v3542_v58 }
 0x2c6   : > { %v3193_v54 = vpack.c.bf16 %v2766_v59, %v2765_v19  ;;  %v2734_v16 = vadd.f32 %v3712_v51, %v3544_v1  ;;  %v2751_v44 = vmax.f32 %v2743_v18, 0.0 }
 0x2c8   : > { %3201 = vst [vmem:[%s5013_s25 + $0x10] sm:$0xff] %v3193_v54   ;;  %v2744_v2 = vadd.f32 %v2734_v16, %v2413_v3  ;;  %v2767_v43 = vadd.f32 %v2759_v5, %v2751_v44 }
 0x2ca   : > { %v2752_v48 = vmax.f32 %v2744_v2, 0.0 }
 0x2cc   : > { %v2768_v32 = vadd.f32 %v2760_v26, %v2752_v48 }
 0x2ce   : > { %v3198_v21 = vpack.c.bf16 %v2768_v32, %v2767_v43 }
 0x2d0   : > { %3202 = vst [vmem:[%s5013_s25 + $0x18] sm:$0xff] %v3198_v21  }
 0x2d1   : > { %4089 = shalt.err (!%p4086_p8)
}
 0x2d2   : > { %s4090_s16 = scalar_lea.hbm %s5035_s13, 512  ;;  %s4094_s8 = scalar_lea.hbm %s5163_s29, 4096 }
 0x2d3   : > { %p4091_p10 = scmp.ne.s32.totalorder %s5035_s13, %s4090_s16  ;;  %p4095_p1 = scmp.lt.s32.totalorder %s5035_s13, %s5163_s29 }
 0x2d4   : > { %p4096_p3 = scmp.lt.s32.totalorder %s4094_s8, %s4090_s16 }
 0x2d5   : > { %p4092_p6 = pnand %p4091_p10, %p4311_p7 }
 0x2d6   : > { %p4097_p11 = por %p4096_p3, %p4095_p1 }
 0x2d7   : > { %p4093_p9 = pneg %p4092_p6 }
 0x2d9   : > { %p4098_p5 = pnand %p4097_p11, %p4093_p9 }
 0x2db   : > { %4101 = shalt.err (!%p4098_p5)
}
 0x2dc   : > { %s4208_s10 = smov 64   ;;  %s4209_s1 = smov 4  }
 0x2dd   : > { %3723 = dma.vmem_to_hbm [thread:$0]  (%p4311_p7), %s5030_s21, 512, %s5035_s13, %s5040_s17, %s4208_s10, %s4208_s10, %s4209_s1  }
 0x2de PF: > { %s5164_s24 = sld [smem:[#allocation12_spill]]  ;;  %p3745_p12 = scmp.ge.s32.totalorder %s4200_s28, 2 }
 0x2df   : > { %s5165_s3 = sld [smem:[#allocation16_spill]] }
 0x2e4   : > { %s2841_s5 = sand.u32 1, %s5164_s24  }
 0x2e5   : > { %p5166_p0 = scmp.ne.s32.totalorder %s5165_s3, 0  ;;  %s2842_s30 = scalar_lea.sflag [#allocation4], %s2841_s5 }
 0x2e7   : > { %p3737_p2 = pnand %p3745_p12, %p5166_p0 }
 0x2e9   : > { %p3738_p4 = pneg %p3737_p2 }
 0x2eb   : > { %4155 = dma.done.wait (%p3738_p4), %s2842_s30, 512  }
 0x2ec   : > { %4157 = vsyncadd (%p3738_p4), %s2842_s30, 4294966784  ;;  %s22_s28 = sadd.s32 1, %s4200_s28   ;;  %s5167_s11 = smov %s4383_s18 }
 0x2ed   : > { %p19_p13 = scmp.ge.s32.totalorder %s22_s28, 10   ;;  %s5168_s24 = sld [smem:[#allocation14_spill]] }
 0x2ee   : > { %s5169_s13 = sld [smem:[#allocation17_spill]]  ;;  %s5170_s18 = smov %s4164_s19 }
 0x2ef   : > { %s5171_s19 = smov %s4168_s20  ;;  %s5172_s20 = smov %s4388_s26 }
 0x2f0   : > { %s5173_s21 = smov %s4176_s22  ;;  %s5174_s22 = smov %s4180_s23 }
 0x2f1   : > { %s5175_s23 = smov %s5167_s11  ;;  %s5176_s25 = smov %s4196_s27 }
 0x2f2   : > { %s5178_s27 = smov %s5184_s14  ;;  %21 = sbr.rel (!%p19_p13) target bundleno = 14 (0xe), region = 100 }
 0x2f4   : > { %s5177_s26 = smov %s5169_s13 }
 0x2f7   :  { %2847 = vsyncpa [#allocation3], 1 }
 0x2f8   :  { %2849 = vsyncpa [#allocation3 + $0x1], 1 }
 0x2f9   :  { %2850 = vsyncpa [#allocation6], 1 }
 0x2fa   :  { %2851 = vsyncpa [#allocation4], 1 }
 0x2fb   :  { %2853 = vsyncpa [#allocation4 + $0x1], 1 }

</bundles_post_ra>
